<compile_context>
chip_gen: v7x
topology: tpu7x:2x2x1
jax: 0.10.0
libtpu: 0.0.40
codegen_flags: <defaults>
</compile_context>

<pallas_src>
import jax
import jax.numpy as jnp
from jax.experimental import pallas as pl
from jax.experimental.pallas import tpu as pltpu


def bottleneck_kernel(x_ref, w1_ref, b1_ref, w2_ref, b2_ref, w3_ref, b3_ref,
                      o_ref, pad_ref):
    nb, hp2, wp2, width = pad_ref.shape
    H, W = hp2 - 2, wp2 - 2
    M = nb * H * W

    # Input block in its native dtype (no extra VALU upcast pass).
    x = x_ref[...]                                         # (M, Cin)

    # ---- conv1 (1x1, BN1 scale folded into w1) + bias + relu ----
    h1 = jnp.dot(x, w1_ref[...], preferred_element_type=jnp.float32)
    h1 = jnp.maximum(h1 + b1_ref[...], 0.0)                # (M, width) f32

    # ---- conv2 (3x3, stride=1, pad=1) as ONE K-concatenated matmul ----
    # Re-zero only the 1-wide halo; the interior is fully overwritten below.
    pad_ref[:, 0:1, :, :] = jnp.zeros((nb, 1, wp2, width), jnp.float32)
    pad_ref[:, H + 1:H + 2, :, :] = jnp.zeros((nb, 1, wp2, width), jnp.float32)
    pad_ref[:, 1:H + 1, 0:1, :] = jnp.zeros((nb, H, 1, width), jnp.float32)
    pad_ref[:, 1:H + 1, W + 1:W + 2, :] = jnp.zeros((nb, H, 1, width),
                                                    jnp.float32)
    pad_ref[:, 1:H + 1, 1:W + 1, :] = h1.reshape(nb, H, W, width)

    # NOTE: each shifted tap read starts at a non-multiple-of-8 sublane
    # offset (masked load); a roll+mask in-register variant would trade this
    # ld/st traffic for XLU work.  K-concatenation keeps it to a single MXU
    # matmul with K = 9*width.
    taps = [pad_ref[:, dy:dy + H, dx:dx + W, :].reshape(M, width)
            for dy in range(3) for dx in range(3)]
    tap_mat = jnp.concatenate(taps, axis=-1)               # (M, 9*width)
    h2 = jnp.dot(tap_mat, w2_ref[...], preferred_element_type=jnp.float32)
    h2 = jnp.maximum(h2 + b2_ref[...], 0.0)                # (M, width)

    # ---- conv3 (1x1) + bias + identity residual + relu ----
    h3 = jnp.dot(h2, w3_ref[...], preferred_element_type=jnp.float32)
    h3 = h3 + b3_ref[...]
    out = jnp.maximum(h3 + x, 0.0)      # identity path (downsample is None)
    o_ref[...] = out.astype(o_ref.dtype)


def bottleneck_pallas(x_nchw, w1, b1, w2, b2, w3, b3, *, block_n=None):
    """x_nchw: (N, Cin, H, W).  Weights already BN-scale-folded (see
    prepare_params).  Returns (N, Cout, H, W)."""
    N, Cin, H, W = x_nchw.shape
    width = w1.shape[1]
    Cout = w3.shape[1]
    # Identity residual only valid for stride=1, no-downsample bottlenecks.
    assert Cin == Cout, "identity residual requires Cin == Cout"

    if block_n is None:
        # Fold enough images per grid step to push the matmul M-dim toward
        # the MXU tile depth (128 on v5e, 256 on v6e/v7x); keep N % nb == 0.
        block_n = max(1, min(N, max(1, 256 // (H * W))))
        while N % block_n:
            block_n -= 1
    nb = block_n
    m_blk = nb * H * W

    # NCHW -> (N*H*W, Cin) so that the 1x1 convs are plain matmuls.
    x2d = jnp.transpose(x_nchw, (0, 2, 3, 1)).reshape(N * H * W, Cin)

    def full_spec(a):
        nd = a.ndim
        return pl.BlockSpec(a.shape, lambda i, _nd=nd: (0,) * _nd)

    out2d = pl.pallas_call(
        bottleneck_kernel,
        out_shape=jax.ShapeDtypeStruct((N * H * W, Cout), x_nchw.dtype),
        grid_spec=pltpu.PrefetchScalarGridSpec(
            num_scalar_prefetch=0,
            grid=(N // nb,),
            in_specs=[pl.BlockSpec((m_blk, Cin), lambda i: (i, 0)),
                      full_spec(w1), full_spec(b1),
                      full_spec(w2), full_spec(b2),
                      full_spec(w3), full_spec(b3)],
            out_specs=pl.BlockSpec((m_blk, Cout), lambda i: (i, 0)),
            scratch_shapes=[pltpu.VMEM((nb, H + 2, W + 2, width),
                                       jnp.float32)]),
        compiler_params=pltpu.CompilerParams(
            dimension_semantics=("parallel",),
            vmem_limit_bytes=32 * 1024 * 1024),
    )(x2d, w1, b1, w2, b2, w3, b3)

    return jnp.transpose(out2d.reshape(N, H, W, Cout), (0, 3, 1, 2))


# ---------------------- weight / BN preparation (wrapper) --------------------
def _fold_bn(gamma, beta, mean, var, eps=1e-5):
    scale = gamma / jnp.sqrt(var + eps)
    bias = beta - mean * scale
    return scale, bias


def prepare_params(wc1, bn1, wc2, bn2, wc3, bn3, eps=1e-5):
    """Fold eval-mode BN into conv weights (one-time constant fold).

    wc1: (width, Cin, 1, 1), wc2: (width, width, 3, 3), wc3: (Cout, width, 1, 1)
    Returns w1 (Cin, width), b1 (1, width), w2 (9*width, width), b2 (1, width),
            w3 (width, Cout), b3 (1, Cout).
    """
    s1, bb1 = _fold_bn(*bn1, eps)
    s2, bb2 = _fold_bn(*bn2, eps)
    s3, bb3 = _fold_bn(*bn3, eps)

    w1 = jnp.transpose(wc1[:, :, 0, 0], (1, 0)) * s1[None, :]
    # (cout, cin, 3, 3) -> (3, 3, cin, cout) -> (9*cin, cout); row index is
    # (ky*3 + kx)*cin + ci, matching the kernel's dy-major / dx-minor tap
    # concatenation order.
    w2 = jnp.transpose(wc2, (2, 3, 1, 0)).reshape(-1, wc2.shape[0]) * s2[None, :]
    w3 = jnp.transpose(wc3[:, :, 0, 0], (1, 0)) * s3[None, :]
    return (w1, bb1.reshape(1, -1), w2, bb2.reshape(1, -1),
            w3, bb3.reshape(1, -1))


# ----------------------------- reference (pure JAX) --------------------------
def _conv_nchw(x, w, padding=0):
    return jax.lax.conv_general_dilated(
        x, w, (1, 1), ((padding, padding), (padding, padding)),
        dimension_numbers=('NCHW', 'OIHW', 'NCHW'))


def _bn_eval(x, gamma, beta, mean, var, eps=1e-5):
    shp = (1, -1, 1, 1)
    return (x - mean.reshape(shp)) / jnp.sqrt(var.reshape(shp) + eps) \
        * gamma.reshape(shp) + beta.reshape(shp)


def bottleneck_ref(x, wc1, bn1, wc2, bn2, wc3, bn3):
    out = jnp.maximum(_bn_eval(_conv_nchw(x, wc1, 0), *bn1), 0.0)
    out = jnp.maximum(_bn_eval(_conv_nchw(out, wc2, 1), *bn2), 0.0)
    out = _bn_eval(_conv_nchw(out, wc3, 0), *bn3)
    return jnp.maximum(out + x, 0.0)


if __name__ == "__main__":
    # Block config: inplanes=16, planes=4 (expansion=4 -> Cout=16), width=4,
    # stride=1, downsample=None.  Input: NCHW (2, 16, 8, 8).
    inplanes, planes = 16, 4
    width = planes
    cout = planes * 4
    N, H, W = 2, 8, 8

    key = jax.random.PRNGKey(0)
    ks = jax.random.split(key, 16)

    x = jax.random.normal(ks[0], (N, inplanes, H, W), jnp.float32)

    # Conv weights in PyTorch OIHW convention.
    wc1 = jax.random.normal(ks[1], (width, inplanes, 1, 1), jnp.float32) * 0.1
    wc2 = jax.random.normal(ks[2], (width, width, 3, 3), jnp.float32) * 0.1
    wc3 = jax.random.normal(ks[3], (cout, width, 1, 1), jnp.float32) * 0.1

    def bn_params(kg, kb, km, kv, c):
        gamma = 1.0 + 0.1 * jax.random.normal(kg, (c,), jnp.float32)
        beta = 0.1 * jax.random.normal(kb, (c,), jnp.float32)
        mean = 0.1 * jax.random.normal(km, (c,), jnp.float32)
        var = jnp.abs(jax.random.normal(kv, (c,), jnp.float32)) + 0.5
        return gamma, beta, mean, var

    bn1 = bn_params(ks[4], ks[5], ks[6], ks[7], width)
    bn2 = bn_params(ks[8], ks[9], ks[10], ks[11], width)
    bn3 = bn_params(ks[12], ks[13], ks[14], ks[15], cout)

    w1, b1, w2, b2, w3, b3 = prepare_params(wc1, bn1, wc2, bn2, wc3, bn3)

    out = bottleneck_pallas(x, w1, b1, w2, b2, w3, b3)
    out = jax.block_until_ready(out)

    ref = bottleneck_ref(x, wc1, bn1, wc2, bn2, wc3, bn3)
    assert out.shape == ref.shape == (N, cout, H, W)
    assert jnp.allclose(out, ref, atol=1e-4, rtol=1e-4), \
        f"max err {jnp.max(jnp.abs(out - ref))}"
    print("KERNEL_OK")
</pallas_src>

<mosaic_0001>
module attributes {stable_mosaic.version = 11 : i64} {
  func.func @bottleneck_kernel(%arg0: i32, %arg1: memref<128x16xf32, #tpu.memory_space<vmem>>, %arg2: memref<16x4xf32, #tpu.memory_space<vmem>>, %arg3: memref<1x4xf32, #tpu.memory_space<vmem>>, %arg4: memref<36x4xf32, #tpu.memory_space<vmem>>, %arg5: memref<1x4xf32, #tpu.memory_space<vmem>>, %arg6: memref<4x16xf32, #tpu.memory_space<vmem>>, %arg7: memref<1x16xf32, #tpu.memory_space<vmem>>, %arg8: memref<128x16xf32, #tpu.memory_space<vmem>>, %arg9: memref<2x10x10x4xf32, #tpu.memory_space<vmem>>) attributes {dimension_semantics = [#tpu.dimension_semantics<parallel>], iteration_bounds = array<i64: 1>, scalar_prefetch = 0 : i64, scratch_operands = 1 : i64, tpu.core_type = #tpu.core_type<tc>, window_params = [{transform_indices = @transform_0, window_bounds = array<i64: 128, 16>}, {pipeline_mode = #tpu.pipeline_mode<synchronous>, transform_indices = @transform_1, window_bounds = array<i64: 16, 4>}, {pipeline_mode = #tpu.pipeline_mode<synchronous>, transform_indices = @transform_2, window_bounds = array<i64: 1, 4>}, {pipeline_mode = #tpu.pipeline_mode<synchronous>, transform_indices = @transform_3, window_bounds = array<i64: 36, 4>}, {pipeline_mode = #tpu.pipeline_mode<synchronous>, transform_indices = @transform_4, window_bounds = array<i64: 1, 4>}, {pipeline_mode = #tpu.pipeline_mode<synchronous>, transform_indices = @transform_5, window_bounds = array<i64: 4, 16>}, {pipeline_mode = #tpu.pipeline_mode<synchronous>, transform_indices = @transform_6, window_bounds = array<i64: 1, 16>}, {transform_indices = @transform_7, window_bounds = array<i64: 128, 16>}]} {
    %c0 = arith.constant 0 : index
    %c0_0 = arith.constant 0 : index
    %0 = vector.load %arg1[%c0, %c0_0] : memref<128x16xf32, #tpu.memory_space<vmem>>, vector<128x16xf32>
    %c0_1 = arith.constant 0 : index
    %c0_2 = arith.constant 0 : index
    %1 = vector.load %arg2[%c0_1, %c0_2] : memref<16x4xf32, #tpu.memory_space<vmem>>, vector<16x4xf32>
    %cst = arith.constant dense<0.000000e+00> : vector<128x4xf32>
    %2 = tpu.matmul %0, %1, %cst {dimension_numbers = #tpu.dot_dimension_numbers<[1], [0], [0], [1], [0, 0, 1, 1], [], []>} : vector<128x16xf32>, vector<16x4xf32>, vector<128x4xf32> -> vector<128x4xf32>
    %c0_3 = arith.constant 0 : index
    %c0_4 = arith.constant 0 : index
    %3 = vector.load %arg3[%c0_3, %c0_4] : memref<1x4xf32, #tpu.memory_space<vmem>>, vector<1x4xf32>
    %4 = vector.broadcast %3 : vector<1x4xf32> to vector<128x4xf32>
    %5 = arith.addf %2, %4 : vector<128x4xf32>
    %cst_5 = arith.constant 0.000000e+00 : f32
    %6 = vector.broadcast %cst_5 : f32 to vector<128x4xf32>
    %7 = arith.maximumf %5, %6 : vector<128x4xf32>
    %cst_6 = arith.constant 0.000000e+00 : f32
    %8 = vector.broadcast %cst_6 : f32 to vector<2x1x10x4xf32>
    %c0_7 = arith.constant 0 : index
    %c0_8 = arith.constant 0 : index
    %c0_9 = arith.constant 0 : index
    %c0_10 = arith.constant 0 : index
    %9 = vector.load %arg9[%c0_7, %c0_8, %c0_9, %c0_10] : memref<2x10x10x4xf32, #tpu.memory_space<vmem>>, vector<2x1x10x4xf32>
    tpu.vector_store %arg9[%c0_7, %c0_8, %c0_9, %c0_10], %8 {strides = array<i32>} : memref<2x10x10x4xf32, #tpu.memory_space<vmem>>, vector<2x1x10x4xf32>,
    %cst_11 = arith.constant 0.000000e+00 : f32
    %10 = vector.broadcast %cst_11 : f32 to vector<2x1x10x4xf32>
    %c0_12 = arith.constant 0 : index
    %c9 = arith.constant 9 : index
    %c0_13 = arith.constant 0 : index
    %c0_14 = arith.constant 0 : index
    %11 = vector.load %arg9[%c0_12, %c9, %c0_13, %c0_14] : memref<2x10x10x4xf32, #tpu.memory_space<vmem>>, vector<2x1x10x4xf32>
    tpu.vector_store %arg9[%c0_12, %c9, %c0_13, %c0_14], %10 {strides = array<i32>} : memref<2x10x10x4xf32, #tpu.memory_space<vmem>>, vector<2x1x10x4xf32>,
    %cst_15 = arith.constant 0.000000e+00 : f32
    %12 = vector.broadcast %cst_15 : f32 to vector<2x8x1x4xf32>
    %c0_16 = arith.constant 0 : index
    %c1 = arith.constant 1 : index
    %c0_17 = arith.constant 0 : index
    %c0_18 = arith.constant 0 : index
    %13 = vector.load %arg9[%c0_16, %c1, %c0_17, %c0_18] : memref<2x10x10x4xf32, #tpu.memory_space<vmem>>, vector<2x8x1x4xf32>
    tpu.vector_store %arg9[%c0_16, %c1, %c0_17, %c0_18], %12 {strides = array<i32>} : memref<2x10x10x4xf32, #tpu.memory_space<vmem>>, vector<2x8x1x4xf32>,
    %cst_19 = arith.constant 0.000000e+00 : f32
    %14 = vector.broadcast %cst_19 : f32 to vector<2x8x1x4xf32>
    %c0_20 = arith.constant 0 : index
    %c1_21 = arith.constant 1 : index
    %c9_22 = arith.constant 9 : index
    %c0_23 = arith.constant 0 : index
    %15 = vector.load %arg9[%c0_20, %c1_21, %c9_22, %c0_23] : memref<2x10x10x4xf32, #tpu.memory_space<vmem>>, vector<2x8x1x4xf32>
    tpu.vector_store %arg9[%c0_20, %c1_21, %c9_22, %c0_23], %14 {strides = array<i32>} : memref<2x10x10x4xf32, #tpu.memory_space<vmem>>, vector<2x8x1x4xf32>,
    %16 = vector.shape_cast %7 : vector<128x4xf32> to vector<2x8x8x4xf32>
    %c0_24 = arith.constant 0 : index
    %c1_25 = arith.constant 1 : index
    %c1_26 = arith.constant 1 : index
    %c0_27 = arith.constant 0 : index
    %17 = vector.load %arg9[%c0_24, %c1_25, %c1_26, %c0_27] : memref<2x10x10x4xf32, #tpu.memory_space<vmem>>, vector<2x8x8x4xf32>
    tpu.vector_store %arg9[%c0_24, %c1_25, %c1_26, %c0_27], %16 {strides = array<i32>} : memref<2x10x10x4xf32, #tpu.memory_space<vmem>>, vector<2x8x8x4xf32>,
    %c0_28 = arith.constant 0 : index
    %c0_29 = arith.constant 0 : index
    %c0_30 = arith.constant 0 : index
    %c0_31 = arith.constant 0 : index
    %18 = vector.load %arg9[%c0_28, %c0_29, %c0_30, %c0_31] : memref<2x10x10x4xf32, #tpu.memory_space<vmem>>, vector<2x8x8x4xf32>
    %19 = vector.shape_cast %18 : vector<2x8x8x4xf32> to vector<128x4xf32>
    %c0_32 = arith.constant 0 : index
    %c0_33 = arith.constant 0 : index
    %c1_34 = arith.constant 1 : index
    %c0_35 = arith.constant 0 : index
    %20 = vector.load %arg9[%c0_32, %c0_33, %c1_34, %c0_35] : memref<2x10x10x4xf32, #tpu.memory_space<vmem>>, vector<2x8x8x4xf32>
    %21 = vector.shape_cast %20 : vector<2x8x8x4xf32> to vector<128x4xf32>
    %c0_36 = arith.constant 0 : index
    %c0_37 = arith.constant 0 : index
    %c2 = arith.constant 2 : index
    %c0_38 = arith.constant 0 : index
    %22 = vector.load %arg9[%c0_36, %c0_37, %c2, %c0_38] : memref<2x10x10x4xf32, #tpu.memory_space<vmem>>, vector<2x8x8x4xf32>
    %23 = vector.shape_cast %22 : vector<2x8x8x4xf32> to vector<128x4xf32>
    %c0_39 = arith.constant 0 : index
    %c1_40 = arith.constant 1 : index
    %c0_41 = arith.constant 0 : index
    %c0_42 = arith.constant 0 : index
    %24 = vector.load %arg9[%c0_39, %c1_40, %c0_41, %c0_42] : memref<2x10x10x4xf32, #tpu.memory_space<vmem>>, vector<2x8x8x4xf32>
    %25 = vector.shape_cast %24 : vector<2x8x8x4xf32> to vector<128x4xf32>
    %c0_43 = arith.constant 0 : index
    %c1_44 = arith.constant 1 : index
    %c1_45 = arith.constant 1 : index
    %c0_46 = arith.constant 0 : index
    %26 = vector.load %arg9[%c0_43, %c1_44, %c1_45, %c0_46] : memref<2x10x10x4xf32, #tpu.memory_space<vmem>>, vector<2x8x8x4xf32>
    %27 = vector.shape_cast %26 : vector<2x8x8x4xf32> to vector<128x4xf32>
    %c0_47 = arith.constant 0 : index
    %c1_48 = arith.constant 1 : index
    %c2_49 = arith.constant 2 : index
    %c0_50 = arith.constant 0 : index
    %28 = vector.load %arg9[%c0_47, %c1_48, %c2_49, %c0_50] : memref<2x10x10x4xf32, #tpu.memory_space<vmem>>, vector<2x8x8x4xf32>
    %29 = vector.shape_cast %28 : vector<2x8x8x4xf32> to vector<128x4xf32>
    %c0_51 = arith.constant 0 : index
    %c2_52 = arith.constant 2 : index
    %c0_53 = arith.constant 0 : index
    %c0_54 = arith.constant 0 : index
    %30 = vector.load %arg9[%c0_51, %c2_52, %c0_53, %c0_54] : memref<2x10x10x4xf32, #tpu.memory_space<vmem>>, vector<2x8x8x4xf32>
    %31 = vector.shape_cast %30 : vector<2x8x8x4xf32> to vector<128x4xf32>
    %c0_55 = arith.constant 0 : index
    %c2_56 = arith.constant 2 : index
    %c1_57 = arith.constant 1 : index
    %c0_58 = arith.constant 0 : index
    %32 = vector.load %arg9[%c0_55, %c2_56, %c1_57, %c0_58] : memref<2x10x10x4xf32, #tpu.memory_space<vmem>>, vector<2x8x8x4xf32>
    %33 = vector.shape_cast %32 : vector<2x8x8x4xf32> to vector<128x4xf32>
    %c0_59 = arith.constant 0 : index
    %c2_60 = arith.constant 2 : index
    %c2_61 = arith.constant 2 : index
    %c0_62 = arith.constant 0 : index
    %34 = vector.load %arg9[%c0_59, %c2_60, %c2_61, %c0_62] : memref<2x10x10x4xf32, #tpu.memory_space<vmem>>, vector<2x8x8x4xf32>
    %35 = vector.shape_cast %34 : vector<2x8x8x4xf32> to vector<128x4xf32>
    %36 = tpu.concatenate %19, %21, %23, %25, %27, %29, %31, %33, %35 in 1 : vector<128x4xf32>, vector<128x4xf32>, vector<128x4xf32>, vector<128x4xf32>, vector<128x4xf32>, vector<128x4xf32>, vector<128x4xf32>, vector<128x4xf32>, vector<128x4xf32> -> vector<128x36xf32>
    %c0_63 = arith.constant 0 : index
    %c0_64 = arith.constant 0 : index
    %37 = vector.load %arg4[%c0_63, %c0_64] : memref<36x4xf32, #tpu.memory_space<vmem>>, vector<36x4xf32>
    %cst_65 = arith.constant dense<0.000000e+00> : vector<128x4xf32>
    %38 = tpu.matmul %36, %37, %cst_65 {dimension_numbers = #tpu.dot_dimension_numbers<[1], [0], [0], [1], [0, 0, 1, 1], [], []>} : vector<128x36xf32>, vector<36x4xf32>, vector<128x4xf32> -> vector<128x4xf32>
    %c0_66 = arith.constant 0 : index
    %c0_67 = arith.constant 0 : index
    %39 = vector.load %arg5[%c0_66, %c0_67] : memref<1x4xf32, #tpu.memory_space<vmem>>, vector<1x4xf32>
    %40 = vector.broadcast %39 : vector<1x4xf32> to vector<128x4xf32>
    %41 = arith.addf %38, %40 : vector<128x4xf32>
    %cst_68 = arith.constant 0.000000e+00 : f32
    %42 = vector.broadcast %cst_68 : f32 to vector<128x4xf32>
    %43 = arith.maximumf %41, %42 : vector<128x4xf32>
    %c0_69 = arith.constant 0 : index
    %c0_70 = arith.constant 0 : index
    %44 = vector.load %arg6[%c0_69, %c0_70] : memref<4x16xf32, #tpu.memory_space<vmem>>, vector<4x16xf32>
    %cst_71 = arith.constant dense<0.000000e+00> : vector<128x16xf32>
    %45 = tpu.matmul %43, %44, %cst_71 {dimension_numbers = #tpu.dot_dimension_numbers<[1], [0], [0], [1], [0, 0, 1, 1], [], []>} : vector<128x4xf32>, vector<4x16xf32>, vector<128x16xf32> -> vector<128x16xf32>
    %c0_72 = arith.constant 0 : index
    %c0_73 = arith.constant 0 : index
    %46 = vector.load %arg7[%c0_72, %c0_73] : memref<1x16xf32, #tpu.memory_space<vmem>>, vector<1x16xf32>
    %47 = vector.broadcast %46 : vector<1x16xf32> to vector<128x16xf32>
    %48 = arith.addf %45, %47 : vector<128x16xf32>
    %49 = arith.addf %48, %0 : vector<128x16xf32>
    %cst_74 = arith.constant 0.000000e+00 : f32
    %50 = vector.broadcast %cst_74 : f32 to vector<128x16xf32>
    %51 = arith.maximumf %49, %50 : vector<128x16xf32>
    %c0_75 = arith.constant 0 : index
    %c0_76 = arith.constant 0 : index
    %52 = vector.load %arg8[%c0_75, %c0_76] : memref<128x16xf32, #tpu.memory_space<vmem>>, vector<128x16xf32>
    tpu.vector_store %arg8[%c0_75, %c0_76], %51 {strides = array<i32>} : memref<128x16xf32, #tpu.memory_space<vmem>>, vector<128x16xf32>,
    return
  }
  func.func @transform_0(%arg0: i32) -> (i32, i32) {
    %c0_i32 = arith.constant 0 : i32
    %c0_i32_0 = arith.constant 0 : i32
    return %arg0, %c0_i32 : i32, i32
  }
  func.func @transform_1(%arg0: i32) -> (i32, i32) {
    %c0_i32 = arith.constant 0 : i32
    %c0_i32_0 = arith.constant 0 : i32
    %c0_i32_1 = arith.constant 0 : i32
    return %c0_i32, %c0_i32_0 : i32, i32
  }
  func.func @transform_2(%arg0: i32) -> (i32, i32) {
    %c0_i32 = arith.constant 0 : i32
    %c0_i32_0 = arith.constant 0 : i32
    %c0_i32_1 = arith.constant 0 : i32
    return %c0_i32, %c0_i32_0 : i32, i32
  }
  func.func @transform_3(%arg0: i32) -> (i32, i32) {
    %c0_i32 = arith.constant 0 : i32
    %c0_i32_0 = arith.constant 0 : i32
    %c0_i32_1 = arith.constant 0 : i32
    return %c0_i32, %c0_i32_0 : i32, i32
  }
  func.func @transform_4(%arg0: i32) -> (i32, i32) {
    %c0_i32 = arith.constant 0 : i32
    %c0_i32_0 = arith.constant 0 : i32
    %c0_i32_1 = arith.constant 0 : i32
    return %c0_i32, %c0_i32_0 : i32, i32
  }
  func.func @transform_5(%arg0: i32) -> (i32, i32) {
    %c0_i32 = arith.constant 0 : i32
    %c0_i32_0 = arith.constant 0 : i32
    %c0_i32_1 = arith.constant 0 : i32
    return %c0_i32, %c0_i32_0 : i32, i32
  }
  func.func @transform_6(%arg0: i32) -> (i32, i32) {
    %c0_i32 = arith.constant 0 : i32
    %c0_i32_0 = arith.constant 0 : i32
    %c0_i32_1 = arith.constant 0 : i32
    return %c0_i32, %c0_i32_0 : i32, i32
  }
  func.func @transform_7(%arg0: i32) -> (i32, i32) {
    %c0_i32 = arith.constant 0 : i32
    %c0_i32_0 = arith.constant 0 : i32
    return %arg0, %c0_i32 : i32, i32
  }
}

</mosaic_0001>

<bundles_post_ra>
// kernel: tpu_custom_call.1
= control target key start
LH: loop header
LB: loop body
LE: loop exit
PB: predicated region body
PF: predicated region fallthrough
CT: control target
= control target key end

     0   :  { %vm51_vm0 = vcmask 130048   ;;  %vm261_vm1 = vcmask 31744   ;;  %vm263_vm2 = vcmask 25600   ;;  %v1831_v3 = vmov 0.0   ;;  %s1832_s24 = smov 8   ;;  %s1833_s25 = smov 4   ;;  %s2731_s1 = inlined_call_operand.vmem [shape: f32[16,4], index: 1, kind: input, shape index: {}]   ;;  %s2732_s0 = inlined_call_operand.vmem [shape: f32[128,16], index: 0, kind: input, shape index: {}]   ;;  %s2733_s2 = inlined_call_operand.vmem [shape: f32[1,4], index: 2, kind: input, shape index: {}]   ;;  %s2734_s3 = inlined_call_operand.vmem [shape: f32[36,4], index: 3, kind: input, shape index: {}]   ;;  %s2735_s5 = inlined_call_operand.vmem [shape: f32[4,16], index: 5, kind: input, shape index: {}]   ;;  %s2736_s4 = inlined_call_operand.vmem [shape: f32[1,4], index: 4, kind: input, shape index: {}]   ;;  %s2737_s6 = inlined_call_operand.vmem [shape: f32[1,16], index: 6, kind: input, shape index: {}]   ;;  %s2738_s7 = inlined_call_operand.vmem [shape: f32[128,16], index: 7, kind: output, shape index: {}]  }
   0x1   :  { %v42_v0 = vld [vmem:[%s2731_s1] sm:$0xff]  ;;  %v43_v1 = vld [vmem:[%s2731_s1 + $0x8] sm:$0xff]  ;;  %262 = vst.msk [vmem:[#allocation2] sm:$0xff] %vm261_vm1, %v1831_v3  ;;  %265 = vst.msk [vmem:[#allocation2 + $0xa0] sm:$0xff] %vm261_vm1, %v1831_v3  ;;  %vm273_vm3 = vcmask 24576   ;;  %s1834_s14 = smov 32  }
   0x2   :  { %v26_v2 = vld [vmem:[%s2732_s0] sm:$0xff]  ;;  %264 = vst.msk [vmem:[#allocation2 + $0x8] sm:$0x3] %vm263_vm2, %v1831_v3  ;;  %266 = vst.msk [vmem:[#allocation2 + $0xa8] sm:$0x3] %vm263_vm2, %v1831_v3  ;;  %v1792_v4 = vpack.c.bf16 %v43_v1, %v42_v0  ;;  %v27_v6 = vld [vmem:[%s2732_s0 + $0x8] sm:$0xff] }
   0x3   :  { %268 = vst.msk [vmem:[#allocation2 + $0x90] sm:$0xff] %vm261_vm1, %v1831_v3  ;;  %270 = vst.msk [vmem:[#allocation2 + $0x130] sm:$0xff] %vm261_vm1, %v1831_v3  ;;  %1708 = vmatprep.mubr.msk.f32.mxu0 %vm51_vm0, %v26_v2  ;;  %v34_v5 = vld [vmem:[%s2732_s0 + $0x40] sm:$0xff]  ;;  %v35_v7 = vld [vmem:[%s2732_s0 + $0x48] sm:$0xff]  ;;  %s1835_s15 = smov 24   ;;  %s1836_s16 = smov 28  }
   0x4   :  { %269 = vst.msk [vmem:[#allocation2 + $0x98] sm:$0x3] %vm263_vm2, %v1831_v3  ;;  %271 = vst.msk [vmem:[#allocation2 + $0x138] sm:$0x3] %vm263_vm2, %v1831_v3  ;;  %1720 = vmatprep.mubr.msk.f32.mxu1 %vm51_vm0, %v34_v5  ;;  %1793 = vmatprep.subr.bf16.mxu0 %v1792_v4  ;;  %v28_v8 = vld [vmem:[%s2732_s0 + $0x10] sm:$0xff]  ;;  %v29_v12 = vld [vmem:[%s2732_s0 + $0x18] sm:$0xff] }
   0x5   :  { %1804 = vmatprep.subr.bf16.mxu1 %v1792_v4  ;;  %1795 = vmatpush3.bf16.msra.mxu0 %v1792_v4  ;;  %v36_v9 = vld [vmem:[%s2732_s0 + $0x50] sm:$0xff]  ;;  %v37_v13 = vld [vmem:[%s2732_s0 + $0x58] sm:$0xff]  ;;  %v30_v14 = vld [vmem:[%s2732_s0 + $0x20] sm:$0xff]  ;;  %275 = vst.msk [vmem:[#allocation2 + $0x20] sm:$0x1] %vm273_vm3, %v1831_v3  ;;  %s1838_s19 = smov 12  }
   0x6   :  { %1805 = vmatpush3.bf16.msra.mxu1 %v1792_v4  ;;  %v38_v15 = vld [vmem:[%s2732_s0 + $0x60] sm:$0xff]  ;;  %v31_v16 = vld [vmem:[%s2732_s0 + $0x28] sm:$0xff]  ;;  %v32_v18 = vld [vmem:[%s2732_s0 + $0x30] sm:$0xff]  ;;  %274 = vst.msk [vmem:[#allocation2 + $0x10] sm:$0x1] %vm273_vm3, %v1831_v3  ;;  %s1839_s20 = smov 20  }
   0x7   :  { %v39_v17 = vld [vmem:[%s2732_s0 + $0x68] sm:$0xff]  ;;  %v40_v19 = vld [vmem:[%s2732_s0 + $0x70] sm:$0xff]  ;;  %v33_v20 = vld [vmem:[%s2732_s0 + $0x38] sm:$0xff]  ;;  %276 = vst.msk [vmem:[#allocation2 + $0x30] sm:$0x1] %vm273_vm3, %v1831_v3  ;;  %vm1174_vm4 = vcmask 1043456  }
   0x8   :  { %1709 = vmatmul.mubr.msk.f32.vlgmr.msra.gmra.mrb[0].mxu0 %vm51_vm0, %v27_v6  ;;  %v41_v21 = vld [vmem:[%s2732_s0 + $0x78] sm:$0xff]  ;;  %277 = vst.msk [vmem:[#allocation2 + $0x40] sm:$0x1] %vm273_vm3, %v1831_v3  ;;  %278 = vst.msk [vmem:[#allocation2 + $0x50] sm:$0x1] %vm273_vm3, %v1831_v3  ;;  %vm995_vm5 = vcmask 64512  }
   0x9   :  { %1721 = vmatmul.mubr.msk.f32.vlgmr.msra.gmra.mrb[0].mxu1 %vm51_vm0, %v35_v7  ;;  %v354_v10 = vld [vmem:[#allocation2 + $0x2] sm:$0xff]  ;;  %1711 = vmatprep.mubr.msk.f32.mxu0 %vm51_vm0, %v28_v8  ;;  %279 = vst.msk [vmem:[#allocation2 + $0x60] sm:$0x1] %vm273_vm3, %v1831_v3  ;;  %280 = vst.msk [vmem:[#allocation2 + $0x70] sm:$0x1] %vm273_vm3, %v1831_v3  ;;  %vm1012_vm6 = vcmask 97280  }
   0xa   :  { %v338_v11 = vld [vmem:[#allocation2 + $0x1] sm:$0xff]  ;;  %1723 = vmatprep.mubr.msk.f32.mxu1 %vm51_vm0, %v36_v9  ;;  %547 = vrot.lane.b32.xlu1 %v354_v10, %s1832_s24  ;;  %v426_v25 = vld [vmem:[#allocation2 + $0x90] sm:$0xff]  ;;  %281 = vst.msk [vmem:[#allocation2 + $0x80] sm:$0x1] %vm273_vm3, %v1831_v3  ;;  %282 = vst.msk [vmem:[#allocation2 + $0xb0] sm:$0x1] %vm273_vm3, %v1831_v3 }
   0xb   :  { %483 = vrot.lane.b32.xlu0 %v338_v11, %s1833_s25  ;;  %v362_v22 = vld [vmem:[#allocation2 + $0xa2] sm:$0xff]  ;;  %v458_v24 = vld [vmem:[#allocation2 + $0x92] sm:$0xff]  ;;  %283 = vst.msk [vmem:[#allocation2 + $0xc0] sm:$0x1] %vm273_vm3, %v1831_v3  ;;  %284 = vst.msk [vmem:[#allocation2 + $0xd0] sm:$0x1] %vm273_vm3, %v1831_v3 }
   0xc   :  { %1712 = vmatmul.mubr.msk.f32.gmra.mrb[2].mxu0 %vm51_vm0, %v29_v12  ;;  %v346_v23 = vld [vmem:[#allocation2 + $0xa1] sm:$0xff]  ;;  %285 = vst.msk [vmem:[#allocation2 + $0xe0] sm:$0x1] %vm273_vm3, %v1831_v3  ;;  %286 = vst.msk [vmem:[#allocation2 + $0xf0] sm:$0x1] %vm273_vm3, %v1831_v3  ;;  %v434_v26 = vld [vmem:[#allocation2 + $0x130] sm:$0xff] }
   0xd   :  { %1724 = vmatmul.mubr.msk.f32.gmra.mrb[2].mxu1 %vm51_vm0, %v37_v13  ;;  %1714 = vmatprep.mubr.msk.f32.mxu0 %vm51_vm0, %v30_v14  ;;  %287 = vst.msk [vmem:[#allocation2 + $0x100] sm:$0x1] %vm273_vm3, %v1831_v3  ;;  %288 = vst.msk [vmem:[#allocation2 + $0x110] sm:$0x1] %vm273_vm3, %v1831_v3  ;;  %v442_v27 = vld [vmem:[#allocation2 + $0x91] sm:$0xff]  ;;  %vm1062_vm7 = vcmask 195584  }
   0xe   :  { %1726 = vmatprep.mubr.msk.f32.mxu1 %vm51_vm0, %v38_v15  ;;  %563 = vrot.lane.b32.xlu1 %v362_v22, %s1832_s24  ;;  %289 = vst.msk [vmem:[#allocation2 + $0x120] sm:$0x1] %vm273_vm3, %v1831_v3  ;;  %290 = vst.msk [vmem:[#allocation2 + $0x19] sm:$0x1] %vm273_vm3, %v1831_v3  ;;  %v2037_v28 = vld [vmem:[%s2733_s2] ss:$0 sm:$0xff] }
   0xf   :  { %499 = vrot.lane.b32.xlu0 %v346_v23, %s1833_s25  ;;  %291 = vst.msk [vmem:[#allocation2 + $0x29] sm:$0x1] %vm273_vm3, %v1831_v3  ;;  %292 = vst.msk [vmem:[#allocation2 + $0x39] sm:$0x1] %vm273_vm3, %v1831_v3  ;;  %s1837_s2 = smov 16   ;;  %vm1045_vm8 = vcmask 162816  }
  0x10   :  { %1715 = vmatmul.mubr.msk.f32.gmra.mrb[4].mxu0 %vm51_vm0, %v31_v16  ;;  %293 = vst.msk [vmem:[#allocation2 + $0x49] sm:$0x1] %vm273_vm3, %v1831_v3  ;;  %294 = vst.msk [vmem:[#allocation2 + $0x59] sm:$0x1] %vm273_vm3, %v1831_v3  ;;  %vm1079_vm9 = vcmask 228352   ;;  %vm1096_vm10 = vcmask 261120  }
  0x11   :  { %1727 = vmatmul.mubr.msk.f32.gmra.mrb[4].mxu1 %vm51_vm0, %v39_v17  ;;  %1717 = vmatprep.mubr.msk.f32.mxu0 %vm51_vm0, %v32_v18  ;;  %295 = vst.msk [vmem:[#allocation2 + $0x69] sm:$0x1] %vm273_vm3, %v1831_v3  ;;  %296 = vst.msk [vmem:[#allocation2 + $0x79] sm:$0x1] %vm273_vm3, %v1831_v3  ;;  %vm1125_vm11 = vcmask 293888  }
  0x12   :  { %1729 = vmatprep.mubr.msk.f32.mxu1 %vm51_vm0, %v40_v19  ;;  %945 = vrot.lane.b32.xlu1 %v458_v24, %s1834_s14  ;;  %297 = vst.msk [vmem:[#allocation2 + $0x89] sm:$0x1] %vm273_vm3, %v1831_v3  ;;  %298 = vst.msk [vmem:[#allocation2 + $0xb9] sm:$0x1] %vm273_vm3, %v1831_v3 }
  0x13   :  { %817 = vrot.lane.b32.xlu0 %v426_v25, %s1835_s15  ;;  %299 = vst.msk [vmem:[#allocation2 + $0xc9] sm:$0x1] %vm273_vm3, %v1831_v3  ;;  %300 = vst.msk [vmem:[#allocation2 + $0xd9] sm:$0x1] %vm273_vm3, %v1831_v3 }
  0x14   :  { %1718 = vmatmul.mubr.msk.f32.gmra.mrb[6].mxu0 %vm51_vm0, %v33_v20  ;;  %301 = vst.msk [vmem:[#allocation2 + $0xe9] sm:$0x1] %vm273_vm3, %v1831_v3  ;;  %302 = vst.msk [vmem:[#allocation2 + $0xf9] sm:$0x1] %vm273_vm3, %v1831_v3 }
  0x15   :  { %1730 = vmatmul.mubr.msk.f32.gmra.mrb[6].mxu1 %vm51_vm0, %v41_v21  ;;  %303 = vst.msk [vmem:[#allocation2 + $0x109] sm:$0x1] %vm273_vm3, %v1831_v3  ;;  %304 = vst.msk [vmem:[#allocation2 + $0x119] sm:$0x1] %vm273_vm3, %v1831_v3 }
  0x16   :  { %305 = vst.msk [vmem:[#allocation2 + $0x129] sm:$0x1] %vm273_vm3, %v1831_v3  ;;  %833 = vrot.lane.b32.xlu1 %v434_v26, %s1835_s15 }
  0x17   :  { %881 = vrot.lane.b32.xlu0 %v442_v27, %s1836_s16 }
  0xdb   :  { %v1710_v29 = vpop.f32.mrb[0].mxu0 }
  0xdc   :  { %v1722_v30 = vpop.f32.mrb[0].mxu1  ;;  %v172_v31 = vadd.f32 %v1710_v29, %v2037_v28  ;;  %v166_v32 = vpop.f32.mrb[1].mxu0 }
  0xdd   :  { %v212_v33 = vadd.f32 %v1722_v30, %v2037_v28  ;;  %v206_v34 = vpop.f32.mrb[1].mxu1  ;;  %v167_v35 = vadd.f32 %v2037_v28, %v166_v32 }
  0xde   :  { %v207_v36 = vadd.f32 %v2037_v28, %v206_v34  ;;  %v246_v37 = vmax.f32 %v172_v31, 0.0  ;;  %v1113_v34 = vld [vmem:[%s2734_s3] sm:$0xff] }
  0xdf   :  { %v254_v38 = vmax.f32 %v212_v33, 0.0  ;;  %v245_v39 = vmax.f32 %v167_v35, 0.0  ;;  %v1713_v41 = vpop.f32.mrb[2].mxu0  ;;  %v1114_v35 = vld [vmem:[%s2734_s3 + $0x8] sm:$0xff] }
  0xe0   :  { %v253_v40 = vmax.f32 %v207_v36, 0.0  ;;  %v1725_v42 = vpop.f32.mrb[2].mxu1  ;;  %307 = vst.msk [vmem:[#allocation2 + $0x21] sm:$0xff] %vm261_vm1, %v246_v37  ;;  %v182_v43 = vadd.f32 %v1713_v41, %v2037_v28  ;;  %v176_v44 = vpop.f32.mrb[3].mxu0  ;;  %v1796_v36 = vpack.c.bf16 %v1114_v35, %v1113_v34 }
  0xe1   :  { %315 = vst.msk [vmem:[#allocation2 + $0xc1] sm:$0xff] %vm261_vm1, %v254_v38  ;;  %v222_v45 = vadd.f32 %v1725_v42, %v2037_v28  ;;  %v216_v46 = vpop.f32.mrb[3].mxu1  ;;  %306 = vst.msk [vmem:[#allocation2 + $0x11] sm:$0xff] %vm261_vm1, %v245_v39  ;;  %v177_v47 = vadd.f32 %v2037_v28, %v176_v44  ;;  %v1115_v38 = vld [vmem:[%s2734_s3 + $0x10] sm:$0xff]  ;;  %v1116_v39 = vld [vmem:[%s2734_s3 + $0x18] sm:$0xff]  ;;  %v2154_v41 = vpop.permute.xlu1 %547 }
  0xe2   :  { %314 = vst.msk [vmem:[#allocation2 + $0xb1] sm:$0xff] %vm261_vm1, %v253_v40  ;;  %v217_v48 = vadd.f32 %v2037_v28, %v216_v46  ;;  %v248_v49 = vmax.f32 %v182_v43, 0.0  ;;  %1797 = vmatprep.subr.bf16.mxu1 %v1796_v36  ;;  %v1800_v40 = vpack.c.bf16 %v1116_v39, %v1115_v38  ;;  %v2156_v42 = vpop.permute.xlu0 %483  ;;  %v1117_v44 = vld [vmem:[%s2734_s3 + $0x20] sm:$0xf] }
  0xe3   :  { %v256_v50 = vmax.f32 %v222_v45, 0.0  ;;  %v247_v51 = vmax.f32 %v177_v47, 0.0  ;;  %v1716_v53 = vpop.f32.mrb[4].mxu0  ;;  %1799 = vmatpush3.bf16.msra.mxu1 %v1796_v36  ;;  %v330_v38 = vld [vmem:[#allocation2 + $0xa0] sm:$0xff] }
  0xe4   :  { %v255_v52 = vmax.f32 %v217_v48, 0.0  ;;  %v1728_v54 = vpop.f32.mrb[4].mxu1  ;;  %309 = vst.msk [vmem:[#allocation2 + $0x41] sm:$0xff] %vm261_vm1, %v248_v49  ;;  %v192_v55 = vadd.f32 %v1716_v53, %v2037_v28  ;;  %v186_v56 = vpop.f32.mrb[5].mxu0  ;;  %1801 = vmatprep.subr.bf16.mxu1 %v1800_v40 }
  0xe5   :  { %317 = vst.msk [vmem:[#allocation2 + $0xe1] sm:$0xff] %vm261_vm1, %v256_v50  ;;  %v232_v57 = vadd.f32 %v1728_v54, %v2037_v28  ;;  %v226_v58 = vpop.f32.mrb[5].mxu1  ;;  %308 = vst.msk [vmem:[#allocation2 + $0x31] sm:$0xff] %vm261_vm1, %v247_v51  ;;  %v187_v59 = vadd.f32 %v2037_v28, %v186_v56  ;;  %v2169_v46 = vpop.permute.xlu1 %563 }
  0xe6   :  { %316 = vst.msk [vmem:[#allocation2 + $0xd1] sm:$0xff] %vm261_vm1, %v255_v52  ;;  %v227_v60 = vadd.f32 %v2037_v28, %v226_v58  ;;  %v250_v61 = vmax.f32 %v192_v55, 0.0  ;;  %v2171_v47 = vpop.permute.xlu0 %499 }
  0xe7   :  { %v258_v62 = vmax.f32 %v232_v57, 0.0  ;;  %v387_v63 = vld [vmem:[#allocation2 + $0x21] sm:$0xff]  ;;  %v249_v1 = vmax.f32 %v187_v59, 0.0  ;;  %v1719_v9 = vpop.f32.mrb[6].mxu0  ;;  %1803 = vmatpush3.bf16.msra.mxu1 %v1800_v40 }
  0xe8   :  { %v2059_v0 = vld [vmem:[#allocation2 + $0x20] sm:$0xff]  ;;  %v257_v2 = vmax.f32 %v227_v60, 0.0  ;;  %677 = vrot.lane.b32.xlu0 %v387_v63, %s1837_s2  ;;  %311 = vst.msk [vmem:[#allocation2 + $0x61] sm:$0xff] %vm261_vm1, %v250_v61  ;;  %v339_v7 = vld [vmem:[#allocation2 + $0x11] sm:$0xff]  ;;  %v202_v10 = vadd.f32 %v1719_v9, %v2037_v28  ;;  %v196_v13 = vpop.f32.mrb[7].mxu0  ;;  %v1731_v17 = vpop.f32.mrb[6].mxu1  ;;  %1740 = vmatprep.subr.msk.mxu1 %vm1174_vm4, %v1117_v44 }
  0xe9   :  { %613 = vrot.lane.b32.xlu1 %v2059_v0, %s1838_s19  ;;  %319 = vst.msk [vmem:[#allocation2 + $0x101] sm:$0xff] %vm261_vm1, %v258_v62  ;;  %310 = vst.msk [vmem:[#allocation2 + $0x51] sm:$0xff] %vm261_vm1, %v249_v1  ;;  %v403_v3 = vld [vmem:[#allocation2 + $0x22] sm:$0xff]  ;;  %v2082_v8 = vld [vmem:[#allocation2 + $0x10] sm:$0xff]  ;;  %v197_v14 = vadd.f32 %v2037_v28, %v196_v13  ;;  %v242_v18 = vadd.f32 %v1731_v17, %v2037_v28  ;;  %v236_v20 = vpop.f32.mrb[7].mxu1  ;;  %v2177_v48 = vpop.permute.xlu1 %945 }
  0xea   :  { %318 = vst.msk [vmem:[#allocation2 + $0xf1] sm:$0xff] %vm261_vm1, %v257_v2  ;;  %v2070_v4 = vld [vmem:[#allocation2 + $0xc0] sm:$0xff]  ;;  %v347_v11 = vld [vmem:[#allocation2 + $0xb1] sm:$0xff]  ;;  %v252_v12 = vmax.f32 %v202_v10, 0.0  ;;  %v237_v21 = vadd.f32 %v2037_v28, %v236_v20  ;;  %v2179_v49 = vpop.permute.xlu0 %817 }
  0xeb   :  { %v348_v5 = vld [vmem:[#allocation2 + $0xc1] sm:$0xff]  ;;  %v363_v15 = vld [vmem:[#allocation2 + $0xb2] sm:$0xff]  ;;  %v251_v16 = vmax.f32 %v197_v14, 0.0  ;;  %v260_v19 = vmax.f32 %v242_v18, 0.0  ;;  %1741 = vmatpush3.msk.msra.mxu1 %vm1174_vm4, %v1117_v44 }
  0xec   :  { %741 = vrot.lane.b32.xlu0 %v403_v3, %s1839_s20  ;;  %v411_v6 = vld [vmem:[#allocation2 + $0xc2] sm:$0xff]  ;;  %313 = vst.msk [vmem:[#allocation2 + $0x81] sm:$0xff] %vm261_vm1, %v252_v12  ;;  %v259_v23 = vmax.f32 %v237_v21, 0.0  ;;  %v355_v24 = vld [vmem:[#allocation2 + $0x12] sm:$0xff] }
  0xed   :  { %487 = vrot.lane.b32.xlu1 %v387_v63, %s1833_s25  ;;  %312 = vst.msk [vmem:[#allocation2 + $0x71] sm:$0xff] %vm261_vm1, %v251_v16  ;;  %v2102_v22 = vld [vmem:[#allocation2 + $0x40] sm:$0xff]  ;;  %321 = vst.msk [vmem:[#allocation2 + $0x121] sm:$0xff] %vm261_vm1, %v260_v19  ;;  %v2111_v26 = vld [vmem:[#allocation2 + $0xb0] sm:$0xff]  ;;  %v2188_v51 = vpop.permute.xlu1 %833 }
  0xee   :  { %320 = vst.msk [vmem:[#allocation2 + $0x111] sm:$0xff] %vm261_vm1, %v259_v23  ;;  %v342_v25 = vld [vmem:[#allocation2 + $0x41] sm:$0xff]  ;;  %v341_v31 = vld [vmem:[#allocation2 + $0x31] sm:$0xff]  ;;  %v2190_v52 = vpop.permute.xlu0 %881 }
  0xef   :  { %v405_v27 = vld [vmem:[#allocation2 + $0x42] sm:$0xff]  ;;  %v357_v32 = vld [vmem:[#allocation2 + $0x32] sm:$0xff] }
  0xf0   :  { %629 = vrot.lane.b32.xlu0 %v2070_v4, %s1838_s19  ;;  %v2116_v28 = vld [vmem:[#allocation2 + $0xe0] sm:$0xff]  ;;  %v2130_v33 = vld [vmem:[#allocation2 + $0x30] sm:$0xff] }
  0xf1   :  { %551 = vrot.lane.b32.xlu1 %v403_v3, %s1832_s24  ;;  %v350_v29 = vld [vmem:[#allocation2 + $0xe1] sm:$0xff]  ;;  %v349_v37 = vld [vmem:[#allocation2 + $0xd1] sm:$0xff] }
  0xf2   :  { %v413_v30 = vld [vmem:[#allocation2 + $0xe2] sm:$0xff]  ;;  %v365_v43 = vld [vmem:[#allocation2 + $0xd2] sm:$0xff] }
  0xf3   :  { %v2163_v45 = vld [vmem:[#allocation2 + $0xd0] sm:$0xff]  ;;  %v2183_v50 = vld [vmem:[#allocation2 + $0x60] sm:$0xff] }
  0xf4   :  { %503 = vrot.lane.b32.xlu0 %v348_v5, %s1833_s25  ;;  %v344_v53 = vld [vmem:[#allocation2 + $0x61] sm:$0xff]  ;;  %v2227_v10 = vld [vmem:[#allocation2 + $0x52] sm:$0xff] }
  0xf5   :  { %803 = vrot.lane.b32.xlu1 %v2059_v0, %s1835_s15  ;;  %v407_v56 = vld [vmem:[#allocation2 + $0x62] sm:$0xff]  ;;  %v2234_v13 = vld [vmem:[#allocation2 + $0x50] sm:$0xff] }
  0xf6   :  { %v2201_v57 = vld [vmem:[#allocation2 + $0x100] sm:$0xff]  ;;  %v351_v20 = vld [vmem:[#allocation2 + $0xf1] sm:$0xff] }
  0xf7   :  { %v352_v62 = vld [vmem:[#allocation2 + $0x101] sm:$0xff] }
  0xf8   :  { %757 = vrot.lane.b32.xlu0 %v411_v6, %s1839_s20  ;;  %v415_v2 = vld [vmem:[#allocation2 + $0x102] sm:$0xff] }
  0xf9   :  { %867 = vrot.lane.b32.xlu1 %v387_v63, %s1836_s16  ;;  %v322_v21 = vld [vmem:[#allocation2] sm:$0xff] }
  0xfc   :  { %485 = vrot.lane.b32.xlu0 %v339_v7, %s1833_s25 }
  0xfd   :  { %931 = vrot.lane.b32.xlu1 %v403_v3, %s1834_s14 }
 0x100   :  { %611 = vrot.lane.b32.xlu0 %v2082_v8, %s1838_s19 }
 0x101   :  { %693 = vrot.lane.b32.xlu1 %v348_v5, %s1837_s2 }
 0x104   :  { %675 = vrot.lane.b32.xlu0 %v339_v7, %s1837_s2 }
 0x105   :  { %567 = vrot.lane.b32.xlu1 %v411_v6, %s1832_s24 }
 0x108   :  { %501 = vrot.lane.b32.xlu0 %v347_v11, %s1833_s25 }
 0x109   :  { %819 = vrot.lane.b32.xlu1 %v2070_v4, %s1835_s15 }
 0x10c   :  { %565 = vrot.lane.b32.xlu0 %v363_v15, %s1832_s24 }
 0x10d   :  { %883 = vrot.lane.b32.xlu1 %v348_v5, %s1836_s16 }
 0x110   :  { %755 = vrot.lane.b32.xlu0 %v363_v15, %s1839_s20 }
 0x111   :  { %947 = vrot.lane.b32.xlu1 %v411_v6, %s1834_s14  ;;  %v343_v6 = vld [vmem:[#allocation2 + $0x51] sm:$0xff] }
 0x114   :  { %617 = vrot.lane.b32.xlu0 %v2102_v22, %s1838_s19 }
 0x115   :  { %549 = vrot.lane.b32.xlu1 %v355_v24, %s1832_s24 }
 0x118   :  { %491 = vrot.lane.b32.xlu0 %v342_v25, %s1833_s25 }
 0x119   :  { %739 = vrot.lane.b32.xlu1 %v355_v24, %s1839_s20 }
 0x11c   :  { %745 = vrot.lane.b32.xlu0 %v405_v27, %s1839_s20 }
 0x11d   :  { %627 = vrot.lane.b32.xlu1 %v2111_v26, %s1838_s19 }
 0x120   :  { %633 = vrot.lane.b32.xlu0 %v2116_v28, %s1838_s19 }
 0x121   :  { %691 = vrot.lane.b32.xlu1 %v347_v11, %s1837_s2 }
 0x124   :  { %507 = vrot.lane.b32.xlu0 %v350_v29, %s1833_s25 }
 0x125   :  { %681 = vrot.lane.b32.xlu1 %v342_v25, %s1837_s2 }
 0x128   :  { %761 = vrot.lane.b32.xlu0 %v413_v30, %s1839_s20 }
 0x129   :  { %555 = vrot.lane.b32.xlu1 %v405_v27, %s1832_s24 }
 0x12c   :  { %489 = vrot.lane.b32.xlu0 %v341_v31, %s1833_s25 }
 0x12d   :  { %807 = vrot.lane.b32.xlu1 %v2102_v22, %s1835_s15 }
 0x130   :  { %553 = vrot.lane.b32.xlu0 %v357_v32, %s1832_s24 }
 0x131   :  { %871 = vrot.lane.b32.xlu1 %v342_v25, %s1836_s16  ;;  %v367_v25 = vld [vmem:[#allocation2 + $0xf2] sm:$0xff] }
 0x134   :  { %805 = vrot.lane.b32.xlu0 %v2130_v33, %s1835_s15 }
 0x135   :  { %935 = vrot.lane.b32.xlu1 %v405_v27, %s1834_s14  ;;  %v979_v27 = vsel %vm261_vm1, %v322_v21, %v2156_v42  ;;  %v987_v42 = vsel %vm261_vm1, %v330_v38, %v2171_v47  ;;  %v393_v38 = vld [vmem:[#allocation2 + $0x81] sm:$0xff] }
 0x138   :  { %869 = vrot.lane.b32.xlu0 %v341_v31, %s1836_s16 }
 0x139   :  { %697 = vrot.lane.b32.xlu1 %v350_v29, %s1837_s2 }
 0x13c   :  { %743 = vrot.lane.b32.xlu0 %v357_v32, %s1839_s20 }
 0x13d   :  { %571 = vrot.lane.b32.xlu1 %v413_v30, %s1832_s24 }
 0x140   :  { %505 = vrot.lane.b32.xlu0 %v349_v37, %s1833_s25 }
 0x141   :  { %823 = vrot.lane.b32.xlu1 %v2116_v28, %s1835_s15 }
 0x144   :  { %569 = vrot.lane.b32.xlu0 %v365_v43, %s1832_s24 }
 0x145   :  { %887 = vrot.lane.b32.xlu1 %v350_v29, %s1836_s16 }
 0x148   :  { %821 = vrot.lane.b32.xlu0 %v2163_v45, %s1835_s15 }
 0x149   :  { %951 = vrot.lane.b32.xlu1 %v413_v30, %s1834_s14 }
 0x14c   :  { %885 = vrot.lane.b32.xlu0 %v349_v37, %s1836_s16 }
 0x14d   :  { %615 = vrot.lane.b32.xlu1 %v2130_v33, %s1838_s19 }
 0x150   :  { %759 = vrot.lane.b32.xlu0 %v365_v43, %s1839_s20 }
 0x151   :  { %679 = vrot.lane.b32.xlu1 %v341_v31, %s1837_s2  ;;  %v2267_v31 = vld [vmem:[#allocation2 + $0xf0] sm:$0xff] }
 0x154   :  { %621 = vrot.lane.b32.xlu0 %v2183_v50, %s1838_s19 }
 0x155   :  { %933 = vrot.lane.b32.xlu1 %v357_v32, %s1834_s14  ;;  %v996_v32 = vsel %vm995_vm5, %v979_v27, %v2154_v41 }
 0x158   :  { %495 = vrot.lane.b32.xlu0 %v344_v53, %s1833_s25 }
 0x159   :  { %631 = vrot.lane.b32.xlu1 %v2163_v45, %s1838_s19 }
 0x15a   :  { %v2195_v54 = vpop.permute.xlu0 %677 }
 0x15b   :  { %v2197_v55 = vpop.permute.xlu1 %613 }
 0x15c   :  { %749 = vrot.lane.b32.xlu0 %v407_v56, %s1839_s20 }
 0x15d   :  { %695 = vrot.lane.b32.xlu1 %v349_v37, %s1837_s2 }
 0x15e   :  { %v2203_v58 = vpop.permute.xlu0 %741 }
 0x15f   :  { %v2205_v59 = vpop.permute.xlu1 %487 }
 0x160   :  { %637 = vrot.lane.b32.xlu0 %v2201_v57, %s1838_s19 }
 0x161   :  { %949 = vrot.lane.b32.xlu1 %v365_v43, %s1834_s14 }
 0x162   :  { %v2210_v60 = vpop.permute.xlu0 %629 }
 0x163   :  { %v2212_v61 = vpop.permute.xlu1 %551 }
 0x164   :  { %511 = vrot.lane.b32.xlu0 %v352_v62, %s1833_s25 }
 0x165   :  { %685 = vrot.lane.b32.xlu1 %v344_v53, %s1837_s2 }
 0x166   :  { %v2216_v63 = vpop.permute.xlu0 %503 }
 0x167   :  { %v804_v1 = vpop.permute.xlu1 %803 }
 0x168   :  { %765 = vrot.lane.b32.xlu0 %v415_v2, %s1839_s20 }
 0x169   :  { %559 = vrot.lane.b32.xlu1 %v407_v56, %s1832_s24 }
 0x16a   :  { %v2220_v3 = vpop.permute.xlu0 %757 }
 0x16b   :  { %v868_v5 = vpop.permute.xlu1 %867 }
 0x16c   :  { %493 = vrot.lane.b32.xlu0 %v343_v6, %s1833_s25 }
 0x16d   :  { %811 = vrot.lane.b32.xlu1 %v2183_v50, %s1835_s15 }
 0x16e   :  { %v2225_v9 = vpop.permute.xlu0 %485 }
 0x16f   :  { %v932_v7 = vpop.permute.xlu1 %931 }
 0x170   :  { %557 = vrot.lane.b32.xlu0 %v2227_v10, %s1832_s24 }
 0x171   :  { %875 = vrot.lane.b32.xlu1 %v344_v53, %s1836_s16 }
 0x172   :  { %v612_v12 = vpop.permute.xlu0 %611 }
 0x173   :  { %v2232_v11 = vpop.permute.xlu1 %693  ;;  %v1013_v34 = vsel %vm1012_vm6, %v996_v32, %v612_v12  ;;  %v409_v12 = vld [vmem:[#allocation2 + $0x82] sm:$0xff] }
 0x174   :  { %809 = vrot.lane.b32.xlu0 %v2234_v13, %s1835_s15 }
 0x175   :  { %939 = vrot.lane.b32.xlu1 %v407_v56, %s1834_s14  ;;  %v1004_v56 = vsel %vm995_vm5, %v987_v42, %v2169_v46  ;;  %v385_v46 = vld [vmem:[#allocation2 + $0x120] sm:$0xff]  ;;  %v345_v42 = vld [vmem:[#allocation2 + $0x71] sm:$0xff] }
 0x176   :  { %v676_v15 = vpop.permute.xlu0 %675 }
 0x177   :  { %v2239_v14 = vpop.permute.xlu1 %567  ;;  %v1029_v35 = vsel %vm51_vm0, %v1013_v34, %v676_v15 }
 0x178   :  { %873 = vrot.lane.b32.xlu0 %v343_v6, %s1836_s16 }
 0x179   :  { %701 = vrot.lane.b32.xlu1 %v352_v62, %s1837_s2 }
 0x17a   :  { %v2245_v17 = vpop.permute.xlu0 %501 }
 0x17b   :  { %v2243_v16 = vpop.permute.xlu1 %819 }
 0x17c   :  { %747 = vrot.lane.b32.xlu0 %v2227_v10, %s1839_s20 }
 0x17d   :  { %575 = vrot.lane.b32.xlu1 %v415_v2, %s1832_s24 }
 0x17e   :  { %v2252_v19 = vpop.permute.xlu0 %565 }
 0x17f   :  { %v2250_v18 = vpop.permute.xlu1 %883 }
 0x180   :  { %509 = vrot.lane.b32.xlu0 %v351_v20, %s1833_s25 }
 0x181   :  { %827 = vrot.lane.b32.xlu1 %v2201_v57, %s1835_s15 }
 0x182   :  { %v2259_v24 = vpop.permute.xlu0 %755 }
 0x183   :  { %v2257_v23 = vpop.permute.xlu1 %947 }
 0x184   :  { %573 = vrot.lane.b32.xlu0 %v367_v25, %s1832_s24 }
 0x185   :  { %891 = vrot.lane.b32.xlu1 %v352_v62, %s1836_s16  ;;  %v377_v62 = vld [vmem:[#allocation2 + $0x80] sm:$0xff] }
 0x186   :  { %v618_v30 = vpop.permute.xlu0 %617 }
 0x187   :  { %v2265_v29 = vpop.permute.xlu1 %549 }
 0x188   :  { %825 = vrot.lane.b32.xlu0 %v2267_v31, %s1835_s15 }
 0x189   :  { %955 = vrot.lane.b32.xlu1 %v415_v2, %s1834_s14 }
 0x18a   :  { %v492_v37 = vpop.permute.xlu0 %491 }
 0x18b   :  { %v740_v36 = vpop.permute.xlu1 %739  ;;  %v983_v15 = vsel %vm261_vm1, %v2102_v22, %v492_v37 }
 0x18c   :  { %v1046_v39 = vsel %vm1045_vm8, %v1029_v35, %v740_v36  ;;  %889 = vrot.lane.b32.xlu0 %v351_v20, %s1836_s16  ;;  %v2309_v35 = vld [vmem:[#allocation2 + $0x121] sm:$0xff] }
 0x18d   :  { %v1063_v40 = vsel %vm1062_vm7, %v1046_v39, %v804_v1  ;;  %619 = vrot.lane.b32.xlu1 %v2234_v13, %s1838_s19 }
 0x18e   :  { %v1080_v41 = vsel %vm1079_vm9, %v1063_v40, %v868_v5  ;;  %v746_v44 = vpop.permute.xlu0 %745 }
 0x18f   :  { %v628_v43 = vpop.permute.xlu1 %627  ;;  %v1097_v53 = vsel %vm1096_vm10, %v1080_v41, %v932_v7 }
 0x190   :  { %1742 = vmatprep.mubr.msk.f32.mxu1 %vm1125_vm11, %v1097_v53  ;;  %763 = vrot.lane.b32.xlu0 %v367_v25, %s1839_s20  ;;  %v1021_v1 = vsel %vm1012_vm6, %v1004_v56, %v628_v43  ;;  %v361_v53 = vld [vmem:[#allocation2 + $0x72] sm:$0xff] }
 0x191   :  { %683 = vrot.lane.b32.xlu1 %v343_v6, %s1837_s2 }
 0x192   :  { %v634_v5 = vpop.permute.xlu0 %633 }
 0x193   :  { %v692_v2 = vpop.permute.xlu1 %691 }
 0x194   :  { %v2292_v47 = vsel %vm51_vm0, %v1021_v1, %v692_v2  ;;  %625 = vrot.lane.b32.xlu0 %v377_v62, %s1838_s19 }
 0x195   :  { %937 = vrot.lane.b32.xlu1 %v2227_v10, %s1834_s14 }
 0x196   :  { %v508_v6 = vpop.permute.xlu0 %507 }
 0x197   :  { %v682_v7 = vpop.permute.xlu1 %681  ;;  %v991_v56 = vsel %vm261_vm1, %v2116_v28, %v508_v6  ;;  %v2349_v28 = vld [vmem:[#allocation2 + $0x122] sm:$0xff] }
 0x198   :  { %753 = vrot.lane.b32.xlu0 %v409_v12, %s1839_s20 }
 0x199   :  { %635 = vrot.lane.b32.xlu1 %v2267_v31, %s1838_s19 }
 0x19a   :  { %v762_v27 = vpop.permute.xlu0 %761 }
 0x19b   :  { %v556_v21 = vpop.permute.xlu1 %555 }
 0x19c   :  { %v2303_v32 = vsel %vm995_vm5, %v983_v15, %v556_v21  ;;  %641 = vrot.lane.b32.xlu0 %v385_v46, %s1838_s19  ;;  %v988_v15 = vsel %vm261_vm1, %v2111_v26, %v2245_v17 }
 0x19d   :  { %699 = vrot.lane.b32.xlu1 %v351_v20, %s1837_s2  ;;  %v1005_v6 = vsel %vm995_vm5, %v988_v15, %v2252_v19 }
 0x19e   :  { %v490_v34 = vpop.permute.xlu0 %489 }
 0x19f   :  { %v2307_v10 = vpop.permute.xlu1 %807  ;;  %v982_v22 = vsel %vm261_vm1, %v2130_v33, %v490_v34 }
 0x1a0   :  { %705 = vrot.lane.b32.xlu0 %v2309_v35, %s1837_s2 }
 0x1a1   :  { %953 = vrot.lane.b32.xlu1 %v367_v25, %s1834_s14 }
 0x1a2   :  { %v554_v37 = vpop.permute.xlu0 %553 }
 0x1a3   :  { %v2316_v36 = vpop.permute.xlu1 %871  ;;  %v999_v20 = vsel %vm995_vm5, %v982_v22, %v554_v37  ;;  %v1022_v22 = vsel %vm1012_vm6, %v1005_v6, %v2210_v60  ;;  %v2397_v6 = vld [vmem:[#allocation2 + $0x110] sm:$0xff] }
 0x1a4   :  { %v1016_v39 = vsel %vm1012_vm6, %v999_v20, %v618_v30  ;;  %831 = vrot.lane.b32.xlu0 %v385_v46, %s1835_s15  ;;  %v1038_v20 = vsel %vm51_vm0, %v1022_v22, %v2232_v11 }
 0x1a5   :  { %689 = vrot.lane.b32.xlu1 %v393_v38, %s1837_s2  ;;  %v1032_v25 = vsel %vm51_vm0, %v1016_v39, %v682_v7  ;;  %v2339_v7 = vld [vmem:[#allocation2 + $0x70] sm:$0xff] }
 0x1a6   :  { %v2325_v41 = vpop.permute.xlu0 %805  ;;  %v2328_v33 = vsel %vm1045_vm8, %v1032_v25, %v746_v44  ;;  %v353_v39 = vld [vmem:[#allocation2 + $0x111] sm:$0xff]  ;;  %v1055_v25 = vsel %vm1045_vm8, %v1038_v20, %v2220_v3 }
 0x1a7   :  { %v2323_v40 = vpop.permute.xlu1 %935 }
 0x1a8   :  { %497 = vrot.lane.b32.xlu0 %v345_v42, %s1833_s25 }
 0x1a9   :  { %815 = vrot.lane.b32.xlu1 %v377_v62, %s1835_s15 }
 0x1aa   :  { %v870_v30 = vpop.permute.xlu0 %869 }
 0x1ab   :  { %v698_v43 = vpop.permute.xlu1 %697 }
 0x1ac   :  { %561 = vrot.lane.b32.xlu0 %v361_v53, %s1832_s24 }
 0x1ad   :  { %879 = vrot.lane.b32.xlu1 %v393_v38, %s1836_s16 }
 0x1ae   :  { %v744_v2 = vpop.permute.xlu0 %743 }
 0x1af   :  { %v572_v1 = vpop.permute.xlu1 %571 }
 0x1b0   :  { %v2337_v44 = vsel %vm995_vm5, %v991_v56, %v572_v1  ;;  %813 = vrot.lane.b32.xlu0 %v2339_v7, %s1835_s15  ;;  %v369_v56 = vld [vmem:[#allocation2 + $0x112] sm:$0xff] }
 0x1b1   :  { %943 = vrot.lane.b32.xlu1 %v409_v12, %s1834_s14 }
 0x1b2   :  { %v506_v46 = vpop.permute.xlu0 %505 }
 0x1b3   :  { %v2344_v62 = vpop.permute.xlu1 %823  ;;  %v990_v12 = vsel %vm261_vm1, %v2163_v45, %v506_v46  ;;  %v980_v45 = vsel %vm261_vm1, %v2082_v8, %v2225_v9 }
 0x1b4   :  { %877 = vrot.lane.b32.xlu0 %v345_v42, %s1836_s16 }
 0x1b5   :  { %769 = vrot.lane.b32.xlu1 %v2349_v28, %s1839_s20 }
 0x1b6   :  { %v570_v34 = vpop.permute.xlu0 %569 }
 0x1b7   :  { %v2358_v21 = vpop.permute.xlu1 %887  ;;  %v1007_v26 = vsel %vm995_vm5, %v990_v12, %v570_v34 }
 0x1b8   :  { %v1024_v17 = vsel %vm1012_vm6, %v1007_v26, %v634_v5  ;;  %751 = vrot.lane.b32.xlu0 %v361_v53, %s1839_s20  ;;  %v997_v5 = vsel %vm995_vm5, %v980_v45, %v2265_v29  ;;  %v981_v29 = vsel %vm261_vm1, %v2059_v0, %v2205_v59 }
 0x1b9   :  { %623 = vrot.lane.b32.xlu1 %v2339_v7, %s1838_s19  ;;  %v1040_v19 = vsel %vm51_vm0, %v1024_v17, %v698_v43  ;;  %v1014_v8 = vsel %vm1012_vm6, %v997_v5, %v2197_v55  ;;  %v998_v3 = vsel %vm995_vm5, %v981_v29, %v2212_v61 }
 0x1ba   :  { %v822_v60 = vpop.permute.xlu0 %821  ;;  %v2374_v38 = vsel %vm1045_vm8, %v1040_v19, %v762_v27  ;;  %v1030_v55 = vsel %vm51_vm0, %v1014_v8, %v2195_v54 }
 0x1bb   :  { %v952_v37 = vpop.permute.xlu1 %951  ;;  %v1072_v9 = vsel %vm1062_vm7, %v1055_v25, %v822_v60  ;;  %v1047_v0 = vsel %vm1045_vm8, %v1030_v55, %v2203_v58 }
 0x1bc   :  { %513 = vrot.lane.b32.xlu0 %v353_v39, %s1833_s25  ;;  %v1064_v54 = vsel %vm1062_vm7, %v1047_v0, %v2325_v41 }
 0x1bd   :  { %687 = vrot.lane.b32.xlu1 %v345_v42, %s1837_s2 }
 0x1be   :  { %v886_v43 = vpop.permute.xlu0 %885 }
 0x1bf   :  { %v616_v11 = vpop.permute.xlu1 %615  ;;  %v1089_v27 = vsel %vm1079_vm9, %v1072_v9, %v886_v43 }
 0x1c0   :  { %577 = vrot.lane.b32.xlu0 %v369_v56, %s1832_s24  ;;  %v1015_v42 = vsel %vm1012_vm6, %v998_v3, %v616_v11 }
 0x1c1   :  { %941 = vrot.lane.b32.xlu1 %v361_v53, %s1834_s14  ;;  %v1081_v53 = vsel %vm1079_vm9, %v1064_v54, %v870_v30  ;;  %v989_v30 = vsel %vm261_vm1, %v2070_v4, %v2216_v63  ;;  %v466_v63 = vld [vmem:[#allocation2 + $0x132] sm:$0xff] }
 0x1c2   :  { %v760_v46 = vpop.permute.xlu0 %759 }
 0x1c3   :  { %v680_v1 = vpop.permute.xlu1 %679 }
 0x1c4   :  { %v1031_v15 = vsel %vm51_vm0, %v1015_v42, %v680_v1  ;;  %829 = vrot.lane.b32.xlu0 %v2397_v6, %s1835_s15 }
 0x1c5   :  { %v1048_v59 = vsel %vm1045_vm8, %v1031_v15, %v744_v2  ;;  %639 = vrot.lane.b32.xlu1 %v2397_v6, %s1838_s19 }
 0x1c6   :  { %v1065_v61 = vsel %vm1062_vm7, %v1048_v59, %v2307_v10  ;;  %v622_v34 = vpop.permute.xlu0 %621 }
 0x1c7   :  { %v934_v12 = vpop.permute.xlu1 %933  ;;  %v1082_v58 = vsel %vm1079_vm9, %v1065_v61, %v2316_v36  ;;  %v1006_v36 = vsel %vm995_vm5, %v989_v30, %v2239_v14 }
 0x1c8   :  { %v1098_v2 = vsel %vm1096_vm10, %v1081_v53, %v934_v12  ;;  %v1099_v22 = vsel %vm1096_vm10, %v1082_v58, %v2323_v40  ;;  %893 = vrot.lane.b32.xlu0 %v353_v39, %s1836_s16  ;;  %v450_v40 = vld [vmem:[#allocation2 + $0x131] sm:$0xff] }
 0x1c9   :  { %703 = vrot.lane.b32.xlu1 %v353_v39, %s1837_s2  ;;  %1743 = vmatmul.mubr.msk.f32.vlgmr.msra.gmra.mrb[8].mxu1 %vm1125_vm11, %v1098_v2 }
 0x1ca   :  { %1745 = vmatprep.mubr.msk.f32.mxu1 %vm1125_vm11, %v1099_v22  ;;  %v496_v41 = vpop.permute.xlu0 %495 }
 0x1cb   :  { %v632_v10 = vpop.permute.xlu1 %631 }
 0x1cc   :  { %957 = vrot.lane.b32.xlu0 %v369_v56, %s1834_s14  ;;  %v1023_v26 = vsel %vm1012_vm6, %v1006_v36, %v632_v10 }
 0x1cd   :  { %767 = vrot.lane.b32.xlu1 %v369_v56, %s1839_s20 }
 0x1ce   :  { %v750_v19 = vpop.permute.xlu0 %749 }
 0x1cf   :  { %v696_v17 = vpop.permute.xlu1 %695 }
 0x1d0   :  { %v1039_v45 = vsel %vm51_vm0, %v1023_v26, %v696_v17  ;;  %895 = vrot.lane.b32.xlu0 %v2309_v35, %s1836_s16 }
 0x1d1   :  { %v1056_v20 = vsel %vm1045_vm8, %v1039_v45, %v760_v46  ;;  %897 = vrot.lane.b32.xlu1 %v450_v40, %s1836_s16 }
 0x1d2   :  { %v1073_v4 = vsel %vm1062_vm7, %v1056_v20, %v2344_v62  ;;  %v638_v14 = vpop.permute.xlu0 %637  ;;  %v985_v62 = vsel %vm261_vm1, %v2183_v50, %v496_v41 }
 0x1d3   :  { %v950_v60 = vpop.permute.xlu1 %949  ;;  %v1090_v5 = vsel %vm1079_vm9, %v1073_v4, %v2358_v21 }
 0x1d4   :  { %v2438_v39 = vsel %vm1096_vm10, %v1089_v27, %v950_v60  ;;  %v2441_v25 = vsel %vm1096_vm10, %v1090_v5, %v952_v37  ;;  %959 = vrot.lane.b32.xlu0 %v2349_v28, %s1834_s14 }
 0x1d5   :  { %961 = vrot.lane.b32.xlu1 %v466_v63, %s1834_s14 }
 0x1d6   :  { %v512_v8 = vpop.permute.xlu0 %511 }
 0x1d7   :  { %v686_v35 = vpop.permute.xlu1 %685  ;;  %v993_v0 = vsel %vm261_vm1, %v2201_v57, %v512_v8 }
 0x1da   :  { %v766_v11 = vpop.permute.xlu0 %765 }
 0x1db   :  { %v560_v9 = vpop.permute.xlu1 %559 }
 0x1dc   :  { %v2449_v21 = vsel %vm995_vm5, %v985_v62, %v560_v9 }
 0x1de   :  { %v494_v27 = vpop.permute.xlu0 %493 }
 0x1df   :  { %v812_v43 = vpop.permute.xlu1 %811  ;;  %v984_v37 = vsel %vm261_vm1, %v2234_v13, %v494_v27 }
 0x1e2   :  { %v558_v29 = vpop.permute.xlu0 %557 }
 0x1e3   :  { %v876_v56 = vpop.permute.xlu1 %875  ;;  %v1001_v3 = vsel %vm995_vm5, %v984_v37, %v558_v29 }
 0x1e4   :  { %v1018_v28 = vsel %vm1012_vm6, %v1001_v3, %v622_v34 }
 0x1e5   :  { %v1034_v55 = vsel %vm51_vm0, %v1018_v28, %v686_v35 }
 0x1e6   :  { %v810_v50 = vpop.permute.xlu0 %809  ;;  %v2457_v1 = vsel %vm1045_vm8, %v1034_v55, %v750_v19 }
 0x1e7   :  { %v940_v42 = vpop.permute.xlu1 %939  ;;  %v1066_v4 = vsel %vm1062_vm7, %v2328_v33, %v810_v50 }
 0x1ea   :  { %v874_v15 = vpop.permute.xlu0 %873 }
 0x1eb   :  { %v702_v46 = vpop.permute.xlu1 %701 }
 0x1ee   :  { %v748_v13 = vpop.permute.xlu0 %747 }
 0x1ef   :  { %v576_v59 = vpop.permute.xlu1 %575 }
 0x1f0   :  { %v2462_v54 = vsel %vm995_vm5, %v993_v0, %v576_v59  ;;  %v1339_v0 = vld [vmem:[%s2735_s5] sm:$0xf] }
 0x1f1   :  { %1766 = vmatprep.subr.msk.mxu0 %vm1174_vm4, %v1339_v0 }
 0x1f2   :  { %v510_v53 = vpop.permute.xlu0 %509  ;;  %1767 = vmatpush3.msk.msra.mxu0 %vm1174_vm4, %v1339_v0 }
 0x1f3   :  { %v828_v61 = vpop.permute.xlu1 %827  ;;  %v992_v12 = vsel %vm261_vm1, %v2267_v31, %v510_v53 }
 0x1f6   :  { %v574_v58 = vpop.permute.xlu0 %573 }
 0x1f7   :  { %v892_v34 = vpop.permute.xlu1 %891  ;;  %v1009_v2 = vsel %vm995_vm5, %v992_v12, %v574_v58 }
 0x1f8   :  { %v1026_v22 = vsel %vm1012_vm6, %v1009_v2, %v638_v14 }
 0x1f9   :  { %v1042_v10 = vsel %vm51_vm0, %v1026_v22, %v702_v46 }
 0x1fa   :  { %v826_v57 = vpop.permute.xlu0 %825  ;;  %v2470_v30 = vsel %vm1045_vm8, %v1042_v10, %v766_v11 }
 0x1fb   :  { %v956_v41 = vpop.permute.xlu1 %955  ;;  %v2474_v36 = vsel %vm1062_vm7, %v2374_v38, %v826_v57  ;;  %v1083_v38 = vsel %vm1079_vm9, %v1066_v4, %v874_v15 }
 0x1fe   :  { %v2476_v26 = vpop.permute.xlu0 %889 }
 0x1ff   :  { %v620_v40 = vpop.permute.xlu1 %619 }
 0x200   :  { %v1017_v31 = vsel %vm1012_vm6, %v2303_v32, %v620_v40 }
 0x202   :  { %v764_v19 = vpop.permute.xlu0 %763 }
 0x203   :  { %v684_v17 = vpop.permute.xlu1 %683 }
 0x204   :  { %v1033_v45 = vsel %vm51_vm0, %v1017_v31, %v684_v17 }
 0x205   :  { %v1050_v20 = vsel %vm1045_vm8, %v1033_v45, %v748_v13 }
 0x206   :  { %v1067_v63 = vsel %vm1062_vm7, %v1050_v20, %v812_v43  ;;  %v626_v14 = vpop.permute.xlu0 %625 }
 0x207   :  { %v938_v60 = vpop.permute.xlu1 %937  ;;  %v1084_v5 = vsel %vm1079_vm9, %v1067_v63, %v876_v56 }
 0x208   :  { %v1100_v35 = vsel %vm1096_vm10, %v1083_v38, %v938_v60  ;;  %v1101_v32 = vsel %vm1096_vm10, %v1084_v5, %v940_v42 }
 0x209   :  { %1746 = vmatmul.mubr.msk.f32.gmra.mrb[10].mxu1 %vm1125_vm11, %v1100_v35 }
 0x20a   :  { %1748 = vmatprep.mubr.msk.f32.mxu1 %vm1125_vm11, %v1101_v32  ;;  %v754_v62 = vpop.permute.xlu0 %753 }
 0x20b   :  { %v636_v8 = vpop.permute.xlu1 %635 }
 0x20c   :  { %v1025_v33 = vsel %vm1012_vm6, %v2337_v44, %v636_v8 }
 0x20e   :  { %v642_v11 = vpop.permute.xlu0 %641 }
 0x20f   :  { %v700_v9 = vpop.permute.xlu1 %699 }
 0x210   :  { %v1041_v43 = vsel %vm51_vm0, %v1025_v33, %v700_v9 }
 0x211   :  { %v1058_v27 = vsel %vm1045_vm8, %v1041_v43, %v764_v19 }
 0x212   :  { %v1075_v37 = vsel %vm1062_vm7, %v1058_v27, %v828_v61  ;;  %v706_v29 = vpop.permute.xlu0 %705 }
 0x213   :  { %v954_v56 = vpop.permute.xlu1 %953  ;;  %v1092_v3 = vsel %vm1079_vm9, %v1075_v37, %v892_v34 }
 0x214   :  { %v2498_v28 = vsel %vm1096_vm10, %v1092_v3, %v956_v41 }
 0x216   :  { %v2500_v42 = vpop.permute.xlu0 %831 }
 0x217   :  { %v690_v55 = vpop.permute.xlu1 %689 }
 0x21a   :  { %v498_v44 = vpop.permute.xlu0 %497 }
 0x21b   :  { %v816_v50 = vpop.permute.xlu1 %815  ;;  %v986_v61 = vsel %vm261_vm1, %v2339_v7, %v498_v44  ;;  %v1054_v7 = vsel %vm1045_vm8, %v2292_v47, %v2259_v24 }
 0x21e   :  { %v562_v15 = vpop.permute.xlu0 %561 }
 0x21f   :  { %v880_v46 = vpop.permute.xlu1 %879  ;;  %v1003_v53 = vsel %vm995_vm5, %v986_v61, %v562_v15 }
 0x220   :  { %v1020_v58 = vsel %vm1012_vm6, %v1003_v53, %v626_v14 }
 0x221   :  { %v1036_v10 = vsel %vm51_vm0, %v1020_v58, %v690_v55 }
 0x222   :  { %v814_v13 = vpop.permute.xlu0 %813  ;;  %v1053_v41 = vsel %vm1045_vm8, %v1036_v10, %v754_v62 }
 0x223   :  { %v944_v59 = vpop.permute.xlu1 %943  ;;  %v1068_v45 = vsel %vm1062_vm7, %v2457_v1, %v814_v13  ;;  %v1070_v4 = vsel %vm1062_vm7, %v1053_v41, %v2179_v49 }
 0x224   :  { %v1087_v1 = vsel %vm1079_vm9, %v1070_v4, %v2190_v52 }
 0x225   :  { %v1104_v35 = vsel %vm1096_vm10, %v1087_v1, %v2177_v48  ;;  %v1091_v48 = vsel %vm1079_vm9, %v2474_v36, %v2476_v26 }
 0x226   :  { %v878_v34 = vpop.permute.xlu0 %877  ;;  %v1108_v9 = vsel %vm1096_vm10, %v1091_v48, %v954_v56 }
 0x227   :  { %v770_v12 = vpop.permute.xlu1 %769  ;;  %v1085_v63 = vsel %vm1079_vm9, %v1068_v45, %v878_v34 }
 0x22a   :  { %v752_v22 = vpop.permute.xlu0 %751 }
 0x22b   :  { %v624_v2 = vpop.permute.xlu1 %623 }
 0x22c   :  { %v1019_v57 = vsel %vm1012_vm6, %v2449_v21, %v624_v2  ;;  %v1071_v21 = vsel %vm1062_vm7, %v1054_v7, %v2243_v16 }
 0x22d   :  { %v1088_v49 = vsel %vm1079_vm9, %v1071_v21, %v2250_v18 }
 0x22e   :  { %v514_v31 = vpop.permute.xlu0 %513  ;;  %v1105_v8 = vsel %vm1096_vm10, %v1088_v49, %v2257_v23 }
 0x22f   :  { %v688_v40 = vpop.permute.xlu1 %687  ;;  %v994_v32 = vsel %vm261_vm1, %v2397_v6, %v514_v31 }
 0x230   :  { %v1035_v17 = vsel %vm51_vm0, %v1019_v57, %v688_v40 }
 0x231   :  { %v1052_v19 = vsel %vm1045_vm8, %v1035_v17, %v752_v22 }
 0x232   :  { %v1069_v20 = vsel %vm1062_vm7, %v1052_v19, %v816_v50  ;;  %v578_v60 = vpop.permute.xlu0 %577 }
 0x233   :  { %v942_v38 = vpop.permute.xlu1 %941  ;;  %v1086_v24 = vsel %vm1079_vm9, %v1069_v20, %v880_v46  ;;  %v1011_v52 = vsel %vm995_vm5, %v994_v32, %v578_v60 }
 0x234   :  { %v1102_v47 = vsel %vm1096_vm10, %v1085_v63, %v942_v38  ;;  %v1103_v14 = vsel %vm1096_vm10, %v1086_v24, %v944_v59  ;;  %v1028_v18 = vsel %vm1012_vm6, %v1011_v52, %v642_v11 }
 0x235   :  { %1749 = vmatmul.mubr.msk.f32.gmra.mrb[12].mxu1 %vm1125_vm11, %v1102_v47  ;;  %v1044_v43 = vsel %vm51_vm0, %v1028_v18, %v706_v29 }
 0x236   :  { %1751 = vmatprep.mubr.msk.f32.mxu1 %vm1125_vm11, %v1103_v14  ;;  %v830_v5 = vpop.permute.xlu0 %829  ;;  %v1061_v37 = vsel %vm1045_vm8, %v1044_v43, %v770_v12 }
 0x237   :  { %v640_v16 = vpop.permute.xlu1 %639 }
 0x238   :  { %v1027_v27 = vsel %vm1012_vm6, %v2462_v54, %v640_v16 }
 0x239   :  { %1752 = vmatmul.mubr.msk.f32.gmra.mrb[14].mxu1 %vm1125_vm11, %v1104_v35 }
 0x23a   :  { %1754 = vmatprep.mubr.msk.f32.mxu1 %vm1125_vm11, %v1105_v8  ;;  %v894_v33 = vpop.permute.xlu0 %893 }
 0x23b   :  { %v704_v62 = vpop.permute.xlu1 %703 }
 0x23d   :  { %1755 = vmatmul.mubr.msk.f32.gmra.mrb[16].mxu1 %vm1125_vm11, %v2438_v39  ;;  %v1076_v39 = vsel %vm1062_vm7, %v2470_v30, %v830_v5  ;;  %v1078_v30 = vsel %vm1062_vm7, %v1061_v37, %v2188_v51  ;;  %v1612_v51 = vld [vmem:[%s2736_s4] ss:$0 sm:$0xff] }
 0x23e   :  { %1757 = vmatprep.mubr.msk.f32.mxu1 %vm1125_vm11, %v2441_v25  ;;  %v958_v23 = vpop.permute.xlu0 %957  ;;  %v1043_v25 = vsel %vm51_vm0, %v1027_v27, %v704_v62  ;;  %v1093_v36 = vsel %vm1079_vm9, %v1076_v39, %v894_v33 }
 0x23f   :  { %v768_v6 = vpop.permute.xlu1 %767  ;;  %v1110_v54 = vsel %vm1096_vm10, %v1093_v36, %v958_v23 }
 0x240   :  { %v1060_v26 = vsel %vm1045_vm8, %v1043_v25, %v768_v6  ;;  %v2601_v25 = vld [vmem:[%s2737_s6] ss:$0 sm:$0xff] }
 0x241   :  { %1758 = vmatmul.mubr.msk.f32.gmra.mrb[18].mxu1 %vm1125_vm11, %v1108_v9  ;;  %v1077_v29 = vsel %vm1062_vm7, %v1060_v26, %v2500_v42 }
 0x242   :  { %1760 = vmatprep.mubr.msk.f32.mxu1 %vm1125_vm11, %v2498_v28  ;;  %v896_v56 = vpop.permute.xlu0 %895 }
 0x243   :  { %v898_v11 = vpop.permute.xlu1 %897  ;;  %v1094_v28 = vsel %vm1079_vm9, %v1077_v29, %v896_v56  ;;  %v1815_v56 = vld [vmem:[%s2732_s0 + $0x8] sm:$0xff] }
 0x244   :  { %v1095_v3 = vsel %vm1079_vm9, %v1078_v30, %v898_v11  ;;  %v1816_v30 = vld [vmem:[%s2732_s0] sm:$0xff] }
 0x245   :  { %1761 = vmatmul.mubr.msk.f32.gmra.mrb[20].mxu1 %vm1125_vm11, %v1110_v54 }
 0x246   :  { %v960_v50 = vpop.permute.xlu0 %959 }
 0x247   :  { %v962_v55 = vpop.permute.xlu1 %961  ;;  %v1111_v46 = vsel %vm1096_vm10, %v1094_v28, %v960_v50 }
 0x248   :  { %v1112_v44 = vsel %vm1096_vm10, %v1095_v3, %v962_v55  ;;  %1763 = vmatprep.mubr.msk.f32.mxu1 %vm1125_vm11, %v1111_v46 }
 0x249   :  { %1764 = vmatmul.mubr.msk.f32.gmra.mrb[22].mxu1 %vm1125_vm11, %v1112_v44 }
 0x29c   :  { %v1744_v15 = vpop.f32.mrb[8].mxu1 }
 0x29d   :  { %v1250_v42 = vadd.f32 %v1744_v15, %v1612_v51  ;;  %v1244_v0 = vpop.f32.mrb[9].mxu1 }
 0x29e   :  { %v1245_v59 = vadd.f32 %v1612_v51, %v1244_v0 }
 0x29f   :  { %v1324_v61 = vmax.f32 %v1250_v42, 0.0  ;;  %v1818_v42 = vld [vmem:[%s2732_s0 + $0x10] sm:$0xff] }
 0x2a0   :  { %v1323_v13 = vmax.f32 %v1245_v59, 0.0 }
 0x2a2   :  { %1768 = vmatprep.mubr.msk.f32.mxu0 %vm261_vm1, %v1323_v13 }
 0x2a3   :  { %1769 = vmatmul.mubr.msk.f32.vlgmr.msra.gmra.mrb[8].mxu0 %vm261_vm1, %v1324_v61 }
 0x2dc   :  { %v1747_v53 = vpop.f32.mrb[10].mxu1 }
 0x2dd   :  { %v1260_v12 = vadd.f32 %v1747_v53, %v1612_v51  ;;  %v1254_v34 = vpop.f32.mrb[11].mxu1 }
 0x2de   :  { %v1255_v58 = vadd.f32 %v1612_v51, %v1254_v34 }
 0x2df   :  { %v1326_v22 = vmax.f32 %v1260_v12, 0.0 }
 0x2e0   :  { %v1325_v2 = vmax.f32 %v1255_v58, 0.0  ;;  %v1819_v58 = vld [vmem:[%s2732_s0 + $0x28] sm:$0xff] }
 0x2e2   :  { %1771 = vmatprep.mubr.msk.f32.mxu0 %vm261_vm1, %v1325_v2 }
 0x2e3   :  { %1772 = vmatmul.mubr.msk.f32.gmra.mrb[10].mxu0 %vm261_vm1, %v1326_v22  ;;  %v1820_v22 = vld [vmem:[%s2732_s0 + $0x20] sm:$0xff] }
 0x308   :  { %v1750_v10 = vpop.f32.mrb[12].mxu1 }
 0x309   :  { %v1270_v41 = vadd.f32 %v1750_v10, %v1612_v51  ;;  %v1264_v57 = vpop.f32.mrb[13].mxu1 }
 0x30a   :  { %v1265_v40 = vadd.f32 %v1612_v51, %v1264_v57 }
 0x30b   :  { %v1328_v17 = vmax.f32 %v1270_v41, 0.0 }
 0x30c   :  { %v1327_v31 = vmax.f32 %v1265_v40, 0.0  ;;  %v1753_v7 = vpop.f32.mrb[14].mxu1 }
 0x30d   :  { %v1280_v19 = vadd.f32 %v1753_v7, %v1612_v51  ;;  %v1274_v45 = vpop.f32.mrb[15].mxu1 }
 0x30e   :  { %v1275_v20 = vadd.f32 %v1612_v51, %v1274_v45  ;;  %1774 = vmatprep.mubr.msk.f32.mxu0 %vm261_vm1, %v1327_v31 }
 0x30f   :  { %1775 = vmatmul.mubr.msk.f32.gmra.mrb[12].mxu0 %vm261_vm1, %v1328_v17  ;;  %v1330_v63 = vmax.f32 %v1280_v19, 0.0  ;;  %v1821_v19 = vld [vmem:[%s2732_s0 + $0x38] sm:$0xff] }
 0x310   :  { %v1329_v4 = vmax.f32 %v1275_v20, 0.0  ;;  %v1756_v21 = vpop.f32.mrb[16].mxu1  ;;  %v1822_v20 = vld [vmem:[%s2732_s0 + $0x30] sm:$0xff] }
 0x311   :  { %v1290_v38 = vadd.f32 %v1756_v21, %v1612_v51  ;;  %v1284_v60 = vpop.f32.mrb[17].mxu1 }
 0x312   :  { %v1285_v24 = vadd.f32 %v1612_v51, %v1284_v60  ;;  %1777 = vmatprep.mubr.msk.f32.mxu0 %vm261_vm1, %v1329_v4 }
 0x313   :  { %1778 = vmatmul.mubr.msk.f32.gmra.mrb[14].mxu0 %vm261_vm1, %v1330_v63  ;;  %v1332_v1 = vmax.f32 %v1290_v38, 0.0 }
 0x314   :  { %v1331_v47 = vmax.f32 %v1285_v24, 0.0  ;;  %v1759_v14 = vpop.f32.mrb[18].mxu1 }
 0x315   :  { %v1300_v49 = vadd.f32 %v1759_v14, %v1612_v51  ;;  %v1294_v16 = vpop.f32.mrb[19].mxu1  ;;  %v1823_v14 = vld [vmem:[%s2732_s0 + $0x48] sm:$0xff] }
 0x316   :  { %v1295_v5 = vadd.f32 %v1612_v51, %v1294_v16  ;;  %1780 = vmatprep.mubr.msk.f32.mxu0 %vm261_vm1, %v1331_v47 }
 0x317   :  { %1781 = vmatmul.mubr.msk.f32.gmra.mrb[16].mxu0 %vm261_vm1, %v1332_v1  ;;  %v1334_v8 = vmax.f32 %v1300_v49, 0.0  ;;  %v1824_v49 = vld [vmem:[%s2732_s0 + $0x40] sm:$0xff] }
 0x318   :  { %v1333_v35 = vmax.f32 %v1295_v5, 0.0  ;;  %v1762_v32 = vpop.f32.mrb[20].mxu1 }
 0x319   :  { %v1310_v52 = vadd.f32 %v1762_v32, %v1612_v51  ;;  %v1304_v62 = vpop.f32.mrb[21].mxu1 }
 0x31a   :  { %v1305_v33 = vadd.f32 %v1612_v51, %v1304_v62  ;;  %1783 = vmatprep.mubr.msk.f32.mxu0 %vm261_vm1, %v1333_v35 }
 0x31b   :  { %1784 = vmatmul.mubr.msk.f32.gmra.mrb[18].mxu0 %vm261_vm1, %v1334_v8  ;;  %v1336_v48 = vmax.f32 %v1310_v52, 0.0 }
 0x31c   :  { %v1335_v18 = vmax.f32 %v1305_v33, 0.0  ;;  %v1765_v6 = vpop.f32.mrb[22].mxu1  ;;  %v1825_v33 = vld [vmem:[%s2732_s0 + $0x58] sm:$0xff] }
 0x31d   :  { %v1320_v23 = vadd.f32 %v1765_v6, %v1612_v51  ;;  %v1314_v9 = vpop.f32.mrb[23].mxu1 }
 0x31e   :  { %1786 = vmatprep.mubr.msk.f32.mxu0 %vm261_vm1, %v1335_v18  ;;  %v1315_v43 = vadd.f32 %v1612_v51, %v1314_v9  ;;  %v1817_v51 = vld [vmem:[%s2732_s0 + $0x18] sm:$0xff] }
 0x31f   :  { %1787 = vmatmul.mubr.msk.f32.gmra.mrb[20].mxu0 %vm261_vm1, %v1336_v48  ;;  %v1338_v39 = vmax.f32 %v1320_v23, 0.0  ;;  %v1826_v48 = vld [vmem:[%s2732_s0 + $0x50] sm:$0xff] }
 0x320   :  { %v1337_v27 = vmax.f32 %v1315_v43, 0.0 }
 0x322   :  { %1789 = vmatprep.mubr.msk.f32.mxu0 %vm261_vm1, %v1337_v27 }
 0x323   :  { %1790 = vmatmul.mubr.msk.f32.gmra.mrb[22].mxu0 %vm261_vm1, %v1338_v39 }
 0x376   :  { %v1770_v36 = vpop.f32.mrb[8].mxu0 }
 0x377   :  { %v1470_v26 = vadd.f32 %v1770_v36, %v2601_v25  ;;  %v1464_v11 = vpop.f32.mrb[9].mxu0 }
 0x378   :  { %v1465_v37 = vadd.f32 %v2601_v25, %v1464_v11 }
 0x379   :  { %v1544_v54 = vadd.f32 %v1815_v56, %v1470_v26  ;;  %v1827_v26 = vld [vmem:[%s2732_s0 + $0x68] sm:$0xff] }
 0x37a   :  { %v1543_v29 = vadd.f32 %v1816_v30, %v1465_v37  ;;  %v1828_v37 = vld [vmem:[%s2732_s0 + $0x60] sm:$0xff] }
 0x37b   :  { %v1560_v3 = vmax.f32 %v1544_v54, 0.0 }
 0x37c   :  { %v1559_v28 = vmax.f32 %v1543_v29, 0.0 }
 0x37d   :  { %1576 = vst.msk [vmem:[%s2738_s7 + $0x8] sm:$0xff] %vm51_vm0, %v1560_v3 }
 0x37e   :  { %1575 = vst.msk [vmem:[%s2738_s7] sm:$0xff] %vm51_vm0, %v1559_v28 }
 0x3b6   :  { %v1773_v55 = vpop.f32.mrb[10].mxu0 }
 0x3b7   :  { %v1480_v50 = vadd.f32 %v1773_v55, %v2601_v25  ;;  %v1474_v44 = vpop.f32.mrb[11].mxu0 }
 0x3b8   :  { %v1475_v46 = vadd.f32 %v2601_v25, %v1474_v44 }
 0x3b9   :  { %v1546_v15 = vadd.f32 %v1817_v51, %v1480_v50  ;;  %v1829_v50 = vld [vmem:[%s2732_s0 + $0x78] sm:$0xff] }
 0x3ba   :  { %v1545_v0 = vadd.f32 %v1818_v42, %v1475_v46  ;;  %v1830_v46 = vld [vmem:[%s2732_s0 + $0x70] sm:$0xff] }
 0x3bb   :  { %v1562_v59 = vmax.f32 %v1546_v15, 0.0 }
 0x3bc   :  { %v1561_v13 = vmax.f32 %v1545_v0, 0.0 }
 0x3bd   :  { %1578 = vst.msk [vmem:[%s2738_s7 + $0x18] sm:$0xff] %vm51_vm0, %v1562_v59 }
 0x3be   :  { %1577 = vst.msk [vmem:[%s2738_s7 + $0x10] sm:$0xff] %vm51_vm0, %v1561_v13 }
 0x3e2   :  { %v1776_v61 = vpop.f32.mrb[12].mxu0 }
 0x3e3   :  { %v1490_v53 = vadd.f32 %v1776_v61, %v2601_v25  ;;  %v1484_v12 = vpop.f32.mrb[13].mxu0 }
 0x3e4   :  { %v1485_v34 = vadd.f32 %v2601_v25, %v1484_v12 }
 0x3e5   :  { %v1548_v2 = vadd.f32 %v1819_v58, %v1490_v53 }
 0x3e6   :  { %v1547_v10 = vadd.f32 %v1820_v22, %v1485_v34  ;;  %v1779_v41 = vpop.f32.mrb[14].mxu0 }
 0x3e7   :  { %v1564_v57 = vmax.f32 %v1548_v2, 0.0  ;;  %v1500_v40 = vadd.f32 %v1779_v41, %v2601_v25  ;;  %v1494_v31 = vpop.f32.mrb[15].mxu0 }
 0x3e8   :  { %v1563_v7 = vmax.f32 %v1547_v10, 0.0  ;;  %v1495_v17 = vadd.f32 %v2601_v25, %v1494_v31 }
 0x3e9   :  { %1580 = vst.msk [vmem:[%s2738_s7 + $0x28] sm:$0xff] %vm51_vm0, %v1564_v57  ;;  %v1550_v45 = vadd.f32 %v1821_v19, %v1500_v40 }
 0x3ea   :  { %1579 = vst.msk [vmem:[%s2738_s7 + $0x20] sm:$0xff] %vm51_vm0, %v1563_v7  ;;  %v1549_v4 = vadd.f32 %v1822_v20, %v1495_v17  ;;  %v1782_v21 = vpop.f32.mrb[16].mxu0 }
 0x3eb   :  { %v1566_v63 = vmax.f32 %v1550_v45, 0.0  ;;  %v1510_v38 = vadd.f32 %v1782_v21, %v2601_v25  ;;  %v1504_v60 = vpop.f32.mrb[17].mxu0 }
 0x3ec   :  { %v1565_v24 = vmax.f32 %v1549_v4, 0.0  ;;  %v1505_v47 = vadd.f32 %v2601_v25, %v1504_v60 }
 0x3ed   :  { %1582 = vst.msk [vmem:[%s2738_s7 + $0x38] sm:$0xff] %vm51_vm0, %v1566_v63  ;;  %v1552_v1 = vadd.f32 %v1823_v14, %v1510_v38 }
 0x3ee   :  { %1581 = vst.msk [vmem:[%s2738_s7 + $0x30] sm:$0xff] %vm51_vm0, %v1565_v24  ;;  %v1551_v16 = vadd.f32 %v1824_v49, %v1505_v47  ;;  %v1785_v5 = vpop.f32.mrb[18].mxu0 }
 0x3ef   :  { %v1568_v35 = vmax.f32 %v1552_v1, 0.0  ;;  %v1520_v32 = vadd.f32 %v1785_v5, %v2601_v25  ;;  %v1514_v8 = vpop.f32.mrb[19].mxu0 }
 0x3f0   :  { %v1567_v52 = vmax.f32 %v1551_v16, 0.0  ;;  %v1515_v62 = vadd.f32 %v2601_v25, %v1514_v8 }
 0x3f1   :  { %1584 = vst.msk [vmem:[%s2738_s7 + $0x48] sm:$0xff] %vm51_vm0, %v1568_v35  ;;  %v1554_v18 = vadd.f32 %v1825_v33, %v1520_v32 }
 0x3f2   :  { %1583 = vst.msk [vmem:[%s2738_s7 + $0x40] sm:$0xff] %vm51_vm0, %v1567_v52  ;;  %v1553_v6 = vadd.f32 %v1826_v48, %v1515_v62  ;;  %v1788_v23 = vpop.f32.mrb[20].mxu0 }
 0x3f3   :  { %v1570_v9 = vmax.f32 %v1554_v18, 0.0  ;;  %v1530_v43 = vadd.f32 %v1788_v23, %v2601_v25  ;;  %v1524_v27 = vpop.f32.mrb[21].mxu0 }
 0x3f4   :  { %v1569_v39 = vmax.f32 %v1553_v6, 0.0  ;;  %v1525_v36 = vadd.f32 %v2601_v25, %v1524_v27 }
 0x3f5   :  { %1586 = vst.msk [vmem:[%s2738_s7 + $0x58] sm:$0xff] %vm51_vm0, %v1570_v9  ;;  %v1556_v11 = vadd.f32 %v1827_v26, %v1530_v43 }
 0x3f6   :  { %1585 = vst.msk [vmem:[%s2738_s7 + $0x50] sm:$0xff] %vm51_vm0, %v1569_v39  ;;  %v1555_v56 = vadd.f32 %v1828_v37, %v1525_v36  ;;  %v1791_v30 = vpop.f32.mrb[22].mxu0 }
 0x3f7   :  { %v1572_v54 = vmax.f32 %v1556_v11, 0.0  ;;  %v1540_v3 = vadd.f32 %v1791_v30, %v2601_v25  ;;  %v1534_v28 = vpop.f32.mrb[23].mxu0 }
 0x3f8   :  { %v1571_v29 = vmax.f32 %v1555_v56, 0.0  ;;  %v1535_v55 = vadd.f32 %v2601_v25, %v1534_v28 }
 0x3f9   :  { %1588 = vst.msk [vmem:[%s2738_s7 + $0x68] sm:$0xff] %vm51_vm0, %v1572_v54  ;;  %v1558_v44 = vadd.f32 %v1829_v50, %v1540_v3 }
 0x3fa   :  { %1587 = vst.msk [vmem:[%s2738_s7 + $0x60] sm:$0xff] %vm51_vm0, %v1571_v29  ;;  %v1557_v51 = vadd.f32 %v1830_v46, %v1535_v55 }
 0x3fb   :  { %v1574_v15 = vmax.f32 %v1558_v44, 0.0 }
 0x3fc   :  { %v1573_v42 = vmax.f32 %v1557_v51, 0.0 }
 0x3fd   :  { %1590 = vst.msk [vmem:[%s2738_s7 + $0x78] sm:$0xff] %vm51_vm0, %v1574_v15 }
 0x3fe   :  { %1589 = vst.msk [vmem:[%s2738_s7 + $0x70] sm:$0xff] %vm51_vm0, %v1573_v42 }

</bundles_post_ra>
